<compile_context>
chip_gen: v5e
topology: v5e:2x2
jax: 0.10.0
libtpu: 0.0.40
codegen_flags: <defaults>
</compile_context>

<pallas_src>
import jax
import jax.numpy as jnp
from jax.experimental import pallas as pl
from jax.experimental.pallas import tpu as pltpu

SEQ = 15
HIDDEN = 32
B_PAD = 8        # pad batch to one full sublane group -> aligned per-step tiles
LANE = 128


def reg_lstm_kernel(x_ref, wih_ref, whh_ref, b_ref, wlin_ref, blin_ref,
                    out_ref, xg_scr):
    """All operands VMEM-resident.

      x_ref   : (SEQ*B_PAD, x_dim)  time-major, batch padded to B_PAD rows
      wih_ref : (x_dim, 4H)         W_ih^T, i/f/o columns pre-scaled by 0.5
      whh_ref : (H, 4H)             W_hh^T, i/f/o columns pre-scaled by 0.5
      b_ref   : (1, 4H)             b_ih + b_hh, i/f/o entries pre-scaled by 0.5
      wlin_ref: (SEQ, H, Y_PAD)     final Linear weight, per-step slabs, lane-padded
      blin_ref: (1, Y_PAD)
      out_ref : (B_PAD, Y_PAD)
    scratch:
      xg_scr  : (SEQ*B_PAD, 4H)     hoisted input projection
    """
    H = HIDDEN
    BP = x_ref.shape[0] // SEQ          # == B_PAD

    # Hoisted input projection + fused bias: one MXU matmul for all timesteps.
    xg_scr[...] = (jnp.dot(x_ref[...], wih_ref[...],
                           preferred_element_type=jnp.float32)
                   + b_ref[...])                               # (SEQ*BP, 4H)
    whh = whh_ref[...]                                         # (H, 4H)

    h = jnp.zeros((BP, H), jnp.float32)
    c = jnp.zeros((BP, H), jnp.float32)
    acc = jnp.zeros((BP, out_ref.shape[1]), jnp.float32)       # running Linear output

    # Fully-unrolled recurrence.  Per step the serial chain is:
    #   (BP,32)x(32,128) matmul -> one tanh over (BP,4H) -> c update -> tanh(c) -> h.
    # The acc matmul never feeds back into h/c, so it hides under the next
    # step's MXU work.
    for t in range(SEQ):
        gates = xg_scr[t * BP:(t + 1) * BP, :] + jnp.dot(
            h, whh, preferred_element_type=jnp.float32)        # (BP, 4H)
        tg = jnp.tanh(gates)                                   # single EUP pass
        i = 0.5 * tg[:, 0 * H:1 * H] + 0.5                     # sigmoid(z) = .5*tanh(z/2)+.5
        f = 0.5 * tg[:, 1 * H:2 * H] + 0.5
        g = tg[:, 2 * H:3 * H]                                 # tanh(z) directly
        o = 0.5 * tg[:, 3 * H:4 * H] + 0.5
        c = f * c + i * g
        h = o * jnp.tanh(c)
        acc = acc + jnp.dot(h, wlin_ref[t],
                            preferred_element_type=jnp.float32)  # (BP, Y_PAD)

    # Single lane-dense output store.
    out_ref[...] = acc + blin_ref[...]


def reg_lstm_forward(x, params):
    """x: (B, seq, x_dim) float32 (batch_first, like the PyTorch module)."""
    w_ih, w_hh, b_ih, b_hh, w_lin, b_lin = params
    B, S, x_dim = x.shape
    assert S == SEQ, "sequence length must match the module's static seq"
    assert B <= B_PAD
    H = HIDDEN
    y_dim = w_lin.shape[0]
    assert w_ih.shape == (4 * H, x_dim)
    assert w_hh.shape == (4 * H, H)
    assert w_lin.shape == (y_dim, H * SEQ)
    y_pad = max(LANE, -(-y_dim // LANE) * LANE)

    # Time-major, batch padded to B_PAD sublanes, then flattened:
    # row t*B_PAD + b holds x[b, t, :].
    x_tm = jnp.transpose(x, (1, 0, 2))                          # (S, B, x_dim)
    x_tm = jnp.pad(x_tm, ((0, 0), (0, B_PAD - B), (0, 0)))      # (S, B_PAD, x_dim)
    x_tm = x_tm.reshape(S * B_PAD, x_dim)

    # tanh-only gate formulation: pre-scale i/f/o gate columns by 0.5
    # (PyTorch gate order [i, f, g, o]); g columns untouched.
    gate_scale = jnp.concatenate([
        0.5 * jnp.ones((2 * H,), jnp.float32),
        jnp.ones((H,), jnp.float32),
        0.5 * jnp.ones((H,), jnp.float32),
    ])
    wih_t = w_ih.T * gate_scale[None, :]                        # (x_dim, 4H)
    whh_t = w_hh.T * gate_scale[None, :]                        # (H, 4H)
    b = ((b_ih + b_hh) * gate_scale).reshape(1, 4 * H)          # (1, 4H)

    # Final Linear weight as per-timestep slabs, lane-padded so the per-step
    # accumulate matmul and the single output store are lane-dense.
    wlin_r = w_lin.T.reshape(SEQ, H, y_dim)                     # [t, h, y]
    wlin_p = jnp.pad(wlin_r, ((0, 0), (0, 0), (0, y_pad - y_dim)))
    blin_p = jnp.pad(b_lin, (0, y_pad - y_dim)).reshape(1, y_pad)

    vmem = pl.BlockSpec(memory_space=pltpu.MemorySpace.VMEM)
    out_p = pl.pallas_call(
        reg_lstm_kernel,
        out_shape=jax.ShapeDtypeStruct((B_PAD, y_pad), jnp.float32),
        in_specs=[vmem] * 6,
        out_specs=vmem,
        scratch_shapes=[
            pltpu.VMEM((SEQ * B_PAD, 4 * H), jnp.float32),      # hoisted input proj
        ],
    )(x_tm, wih_t, whh_t, b, wlin_p, blin_p)
    return out_p[:B, :y_dim]


def reg_lstm_reference(x, params):
    """Pure-JAX reference of the PyTorch forward for validation."""
    w_ih, w_hh, b_ih, b_hh, w_lin, b_lin = params
    B, S, _ = x.shape
    H = HIDDEN
    h = jnp.zeros((B, H), jnp.float32)
    c = jnp.zeros((B, H), jnp.float32)
    outs = []
    for t in range(S):
        gates = x[:, t, :] @ w_ih.T + b_ih + h @ w_hh.T + b_hh
        i = jax.nn.sigmoid(gates[:, 0 * H:1 * H])
        f = jax.nn.sigmoid(gates[:, 1 * H:2 * H])
        g = jnp.tanh(gates[:, 2 * H:3 * H])
        o = jax.nn.sigmoid(gates[:, 3 * H:4 * H])
        c = f * c + i * g
        h = o * jnp.tanh(c)
        outs.append(h)
    seq_out = jnp.stack(outs, axis=1).reshape(B, S * H)
    return seq_out @ w_lin.T + b_lin


def init_params(key, x_dim, y_dim):
    H = HIDDEN
    k = jax.random.split(key, 6)
    s_lstm = 1.0 / jnp.sqrt(H)
    s_lin = 1.0 / jnp.sqrt(H * SEQ)
    w_ih = jax.random.uniform(k[0], (4 * H, x_dim), jnp.float32, -s_lstm, s_lstm)
    w_hh = jax.random.uniform(k[1], (4 * H, H), jnp.float32, -s_lstm, s_lstm)
    b_ih = jax.random.uniform(k[2], (4 * H,), jnp.float32, -s_lstm, s_lstm)
    b_hh = jax.random.uniform(k[3], (4 * H,), jnp.float32, -s_lstm, s_lstm)
    w_lin = jax.random.uniform(k[4], (y_dim, H * SEQ), jnp.float32, -s_lin, s_lin)
    b_lin = jax.random.uniform(k[5], (y_dim,), jnp.float32, -s_lin, s_lin)
    return (w_ih, w_hh, b_ih, b_hh, w_lin, b_lin)


if __name__ == "__main__":
    B, x_dim, y_dim = 2, 8, 4
    key = jax.random.PRNGKey(0)
    kx, kp = jax.random.split(key)
    x = jax.random.normal(kx, (B, SEQ, x_dim), jnp.float32)
    params = init_params(kp, x_dim, y_dim)

    out = reg_lstm_forward(x, params)
    out = jax.block_until_ready(out)

    ref = reg_lstm_reference(x, params)
    assert out.shape == (B, y_dim)
    assert jnp.allclose(out, ref, atol=1e-4, rtol=1e-4), (out, ref)
    print("KERNEL_OK")
</pallas_src>

<mosaic_0001>
module attributes {stable_mosaic.version = 11 : i64} {
  func.func @reg_lstm_kernel(%arg0: memref<120x8xf32, #tpu.memory_space<vmem>>, %arg1: memref<8x128xf32, #tpu.memory_space<vmem>>, %arg2: memref<32x128xf32, #tpu.memory_space<vmem>>, %arg3: memref<1x128xf32, #tpu.memory_space<vmem>>, %arg4: memref<15x32x128xf32, #tpu.memory_space<vmem>>, %arg5: memref<1x128xf32, #tpu.memory_space<vmem>>, %arg6: memref<8x128xf32, #tpu.memory_space<vmem>>, %arg7: memref<120x128xf32, #tpu.memory_space<vmem>>) attributes {dimension_semantics = [], scalar_prefetch = 0 : i64, scratch_operands = 1 : i64, tpu.core_type = #tpu.core_type<tc>} {
    %c0 = arith.constant 0 : index
    %c0_0 = arith.constant 0 : index
    %0 = vector.load %arg0[%c0, %c0_0] : memref<120x8xf32, #tpu.memory_space<vmem>>, vector<120x8xf32>
    %c0_1 = arith.constant 0 : index
    %c0_2 = arith.constant 0 : index
    %1 = vector.load %arg1[%c0_1, %c0_2] : memref<8x128xf32, #tpu.memory_space<vmem>>, vector<8x128xf32>
    %cst = arith.constant dense<0.000000e+00> : vector<120x128xf32>
    %2 = tpu.matmul %0, %1, %cst {dimension_numbers = #tpu.dot_dimension_numbers<[1], [0], [0], [1], [0, 0, 1, 1], [], []>} : vector<120x8xf32>, vector<8x128xf32>, vector<120x128xf32> -> vector<120x128xf32>
    %c0_3 = arith.constant 0 : index
    %c0_4 = arith.constant 0 : index
    %3 = vector.load %arg3[%c0_3, %c0_4] : memref<1x128xf32, #tpu.memory_space<vmem>>, vector<1x128xf32>
    %4 = vector.broadcast %3 : vector<1x128xf32> to vector<120x128xf32>
    %5 = arith.addf %2, %4 : vector<120x128xf32>
    %c0_5 = arith.constant 0 : index
    %c0_6 = arith.constant 0 : index
    %6 = vector.load %arg7[%c0_5, %c0_6] : memref<120x128xf32, #tpu.memory_space<vmem>>, vector<120x128xf32>
    tpu.vector_store %arg7[%c0_5, %c0_6], %5 {strides = array<i32>} : memref<120x128xf32, #tpu.memory_space<vmem>>, vector<120x128xf32>,
    %c0_7 = arith.constant 0 : index
    %c0_8 = arith.constant 0 : index
    %7 = vector.load %arg2[%c0_7, %c0_8] : memref<32x128xf32, #tpu.memory_space<vmem>>, vector<32x128xf32>
    %cst_9 = arith.constant 0.000000e+00 : f32
    %8 = vector.broadcast %cst_9 : f32 to vector<8x32xf32>
    %cst_10 = arith.constant 0.000000e+00 : f32
    %9 = vector.broadcast %cst_10 : f32 to vector<8x32xf32>
    %cst_11 = arith.constant 0.000000e+00 : f32
    %10 = vector.broadcast %cst_11 : f32 to vector<8x128xf32>
    %c0_12 = arith.constant 0 : index
    %c0_13 = arith.constant 0 : index
    %11 = vector.load %arg7[%c0_12, %c0_13] : memref<120x128xf32, #tpu.memory_space<vmem>>, vector<8x128xf32>
    %cst_14 = arith.constant dense<0.000000e+00> : vector<8x128xf32>
    %12 = tpu.matmul %8, %7, %cst_14 {dimension_numbers = #tpu.dot_dimension_numbers<[1], [0], [0], [1], [0, 0, 1, 1], [], []>} : vector<8x32xf32>, vector<32x128xf32>, vector<8x128xf32> -> vector<8x128xf32>
    %13 = arith.addf %11, %12 : vector<8x128xf32>
    %14 = math.tanh %13 : vector<8x128xf32>
    %15 = vector.extract_strided_slice %14 {offsets = [0, 0], sizes = [8, 32], strides = [1, 1]} : vector<8x128xf32> to vector<8x32xf32>
    %cst_15 = arith.constant 5.000000e-01 : f32
    %16 = vector.broadcast %cst_15 : f32 to vector<8x32xf32>
    %17 = arith.mulf %16, %15 : vector<8x32xf32>
    %cst_16 = arith.constant 5.000000e-01 : f32
    %18 = vector.broadcast %cst_16 : f32 to vector<8x32xf32>
    %19 = arith.addf %17, %18 : vector<8x32xf32>
    %20 = vector.extract_strided_slice %14 {offsets = [0, 32], sizes = [8, 32], strides = [1, 1]} : vector<8x128xf32> to vector<8x32xf32>
    %cst_17 = arith.constant 5.000000e-01 : f32
    %21 = vector.broadcast %cst_17 : f32 to vector<8x32xf32>
    %22 = arith.mulf %21, %20 : vector<8x32xf32>
    %cst_18 = arith.constant 5.000000e-01 : f32
    %23 = vector.broadcast %cst_18 : f32 to vector<8x32xf32>
    %24 = arith.addf %22, %23 : vector<8x32xf32>
    %25 = vector.extract_strided_slice %14 {offsets = [0, 64], sizes = [8, 32], strides = [1, 1]} : vector<8x128xf32> to vector<8x32xf32>
    %26 = vector.extract_strided_slice %14 {offsets = [0, 96], sizes = [8, 32], strides = [1, 1]} : vector<8x128xf32> to vector<8x32xf32>
    %cst_19 = arith.constant 5.000000e-01 : f32
    %27 = vector.broadcast %cst_19 : f32 to vector<8x32xf32>
    %28 = arith.mulf %27, %26 : vector<8x32xf32>
    %cst_20 = arith.constant 5.000000e-01 : f32
    %29 = vector.broadcast %cst_20 : f32 to vector<8x32xf32>
    %30 = arith.addf %28, %29 : vector<8x32xf32>
    %31 = arith.mulf %24, %9 : vector<8x32xf32>
    %32 = arith.mulf %19, %25 : vector<8x32xf32>
    %33 = arith.addf %31, %32 : vector<8x32xf32>
    %34 = math.tanh %33 : vector<8x32xf32>
    %35 = arith.mulf %30, %34 : vector<8x32xf32>
    %c0_21 = arith.constant 0 : index
    %c0_22 = arith.constant 0 : index
    %c0_23 = arith.constant 0 : index
    %36 = vector.load %arg4[%c0_21, %c0_22, %c0_23] : memref<15x32x128xf32, #tpu.memory_space<vmem>>, vector<1x32x128xf32>
    %37 = vector.shape_cast %36 : vector<1x32x128xf32> to vector<32x128xf32>
    %cst_24 = arith.constant dense<0.000000e+00> : vector<8x128xf32>
    %38 = tpu.matmul %35, %37, %cst_24 {dimension_numbers = #tpu.dot_dimension_numbers<[1], [0], [0], [1], [0, 0, 1, 1], [], []>} : vector<8x32xf32>, vector<32x128xf32>, vector<8x128xf32> -> vector<8x128xf32>
    %39 = arith.addf %10, %38 : vector<8x128xf32>
    %c8 = arith.constant 8 : index
    %c0_25 = arith.constant 0 : index
    %40 = vector.load %arg7[%c8, %c0_25] : memref<120x128xf32, #tpu.memory_space<vmem>>, vector<8x128xf32>
    %cst_26 = arith.constant dense<0.000000e+00> : vector<8x128xf32>
    %41 = tpu.matmul %35, %7, %cst_26 {dimension_numbers = #tpu.dot_dimension_numbers<[1], [0], [0], [1], [0, 0, 1, 1], [], []>} : vector<8x32xf32>, vector<32x128xf32>, vector<8x128xf32> -> vector<8x128xf32>
    %42 = arith.addf %40, %41 : vector<8x128xf32>
    %43 = math.tanh %42 : vector<8x128xf32>
    %44 = vector.extract_strided_slice %43 {offsets = [0, 0], sizes = [8, 32], strides = [1, 1]} : vector<8x128xf32> to vector<8x32xf32>
    %cst_27 = arith.constant 5.000000e-01 : f32
    %45 = vector.broadcast %cst_27 : f32 to vector<8x32xf32>
    %46 = arith.mulf %45, %44 : vector<8x32xf32>
    %cst_28 = arith.constant 5.000000e-01 : f32
    %47 = vector.broadcast %cst_28 : f32 to vector<8x32xf32>
    %48 = arith.addf %46, %47 : vector<8x32xf32>
    %49 = vector.extract_strided_slice %43 {offsets = [0, 32], sizes = [8, 32], strides = [1, 1]} : vector<8x128xf32> to vector<8x32xf32>
    %cst_29 = arith.constant 5.000000e-01 : f32
    %50 = vector.broadcast %cst_29 : f32 to vector<8x32xf32>
    %51 = arith.mulf %50, %49 : vector<8x32xf32>
    %cst_30 = arith.constant 5.000000e-01 : f32
    %52 = vector.broadcast %cst_30 : f32 to vector<8x32xf32>
    %53 = arith.addf %51, %52 : vector<8x32xf32>
    %54 = vector.extract_strided_slice %43 {offsets = [0, 64], sizes = [8, 32], strides = [1, 1]} : vector<8x128xf32> to vector<8x32xf32>
    %55 = vector.extract_strided_slice %43 {offsets = [0, 96], sizes = [8, 32], strides = [1, 1]} : vector<8x128xf32> to vector<8x32xf32>
    %cst_31 = arith.constant 5.000000e-01 : f32
    %56 = vector.broadcast %cst_31 : f32 to vector<8x32xf32>
    %57 = arith.mulf %56, %55 : vector<8x32xf32>
    %cst_32 = arith.constant 5.000000e-01 : f32
    %58 = vector.broadcast %cst_32 : f32 to vector<8x32xf32>
    %59 = arith.addf %57, %58 : vector<8x32xf32>
    %60 = arith.mulf %53, %33 : vector<8x32xf32>
    %61 = arith.mulf %48, %54 : vector<8x32xf32>
    %62 = arith.addf %60, %61 : vector<8x32xf32>
    %63 = math.tanh %62 : vector<8x32xf32>
    %64 = arith.mulf %59, %63 : vector<8x32xf32>
    %c1 = arith.constant 1 : index
    %c0_33 = arith.constant 0 : index
    %c0_34 = arith.constant 0 : index
    %65 = vector.load %arg4[%c1, %c0_33, %c0_34] : memref<15x32x128xf32, #tpu.memory_space<vmem>>, vector<1x32x128xf32>
    %66 = vector.shape_cast %65 : vector<1x32x128xf32> to vector<32x128xf32>
    %cst_35 = arith.constant dense<0.000000e+00> : vector<8x128xf32>
    %67 = tpu.matmul %64, %66, %cst_35 {dimension_numbers = #tpu.dot_dimension_numbers<[1], [0], [0], [1], [0, 0, 1, 1], [], []>} : vector<8x32xf32>, vector<32x128xf32>, vector<8x128xf32> -> vector<8x128xf32>
    %68 = arith.addf %39, %67 : vector<8x128xf32>
    %c16 = arith.constant 16 : index
    %c0_36 = arith.constant 0 : index
    %69 = vector.load %arg7[%c16, %c0_36] : memref<120x128xf32, #tpu.memory_space<vmem>>, vector<8x128xf32>
    %cst_37 = arith.constant dense<0.000000e+00> : vector<8x128xf32>
    %70 = tpu.matmul %64, %7, %cst_37 {dimension_numbers = #tpu.dot_dimension_numbers<[1], [0], [0], [1], [0, 0, 1, 1], [], []>} : vector<8x32xf32>, vector<32x128xf32>, vector<8x128xf32> -> vector<8x128xf32>
    %71 = arith.addf %69, %70 : vector<8x128xf32>
    %72 = math.tanh %71 : vector<8x128xf32>
    %73 = vector.extract_strided_slice %72 {offsets = [0, 0], sizes = [8, 32], strides = [1, 1]} : vector<8x128xf32> to vector<8x32xf32>
    %cst_38 = arith.constant 5.000000e-01 : f32
    %74 = vector.broadcast %cst_38 : f32 to vector<8x32xf32>
    %75 = arith.mulf %74, %73 : vector<8x32xf32>
    %cst_39 = arith.constant 5.000000e-01 : f32
    %76 = vector.broadcast %cst_39 : f32 to vector<8x32xf32>
    %77 = arith.addf %75, %76 : vector<8x32xf32>
    %78 = vector.extract_strided_slice %72 {offsets = [0, 32], sizes = [8, 32], strides = [1, 1]} : vector<8x128xf32> to vector<8x32xf32>
    %cst_40 = arith.constant 5.000000e-01 : f32
    %79 = vector.broadcast %cst_40 : f32 to vector<8x32xf32>
    %80 = arith.mulf %79, %78 : vector<8x32xf32>
    %cst_41 = arith.constant 5.000000e-01 : f32
    %81 = vector.broadcast %cst_41 : f32 to vector<8x32xf32>
    %82 = arith.addf %80, %81 : vector<8x32xf32>
    %83 = vector.extract_strided_slice %72 {offsets = [0, 64], sizes = [8, 32], strides = [1, 1]} : vector<8x128xf32> to vector<8x32xf32>
    %84 = vector.extract_strided_slice %72 {offsets = [0, 96], sizes = [8, 32], strides = [1, 1]} : vector<8x128xf32> to vector<8x32xf32>
    %cst_42 = arith.constant 5.000000e-01 : f32
    %85 = vector.broadcast %cst_42 : f32 to vector<8x32xf32>
    %86 = arith.mulf %85, %84 : vector<8x32xf32>
    %cst_43 = arith.constant 5.000000e-01 : f32
    %87 = vector.broadcast %cst_43 : f32 to vector<8x32xf32>
    %88 = arith.addf %86, %87 : vector<8x32xf32>
    %89 = arith.mulf %82, %62 : vector<8x32xf32>
    %90 = arith.mulf %77, %83 : vector<8x32xf32>
    %91 = arith.addf %89, %90 : vector<8x32xf32>
    %92 = math.tanh %91 : vector<8x32xf32>
    %93 = arith.mulf %88, %92 : vector<8x32xf32>
    %c2 = arith.constant 2 : index
    %c0_44 = arith.constant 0 : index
    %c0_45 = arith.constant 0 : index
    %94 = vector.load %arg4[%c2, %c0_44, %c0_45] : memref<15x32x128xf32, #tpu.memory_space<vmem>>, vector<1x32x128xf32>
    %95 = vector.shape_cast %94 : vector<1x32x128xf32> to vector<32x128xf32>
    %cst_46 = arith.constant dense<0.000000e+00> : vector<8x128xf32>
    %96 = tpu.matmul %93, %95, %cst_46 {dimension_numbers = #tpu.dot_dimension_numbers<[1], [0], [0], [1], [0, 0, 1, 1], [], []>} : vector<8x32xf32>, vector<32x128xf32>, vector<8x128xf32> -> vector<8x128xf32>
    %97 = arith.addf %68, %96 : vector<8x128xf32>
    %c24 = arith.constant 24 : index
    %c0_47 = arith.constant 0 : index
    %98 = vector.load %arg7[%c24, %c0_47] : memref<120x128xf32, #tpu.memory_space<vmem>>, vector<8x128xf32>
    %cst_48 = arith.constant dense<0.000000e+00> : vector<8x128xf32>
    %99 = tpu.matmul %93, %7, %cst_48 {dimension_numbers = #tpu.dot_dimension_numbers<[1], [0], [0], [1], [0, 0, 1, 1], [], []>} : vector<8x32xf32>, vector<32x128xf32>, vector<8x128xf32> -> vector<8x128xf32>
    %100 = arith.addf %98, %99 : vector<8x128xf32>
    %101 = math.tanh %100 : vector<8x128xf32>
    %102 = vector.extract_strided_slice %101 {offsets = [0, 0], sizes = [8, 32], strides = [1, 1]} : vector<8x128xf32> to vector<8x32xf32>
    %cst_49 = arith.constant 5.000000e-01 : f32
    %103 = vector.broadcast %cst_49 : f32 to vector<8x32xf32>
    %104 = arith.mulf %103, %102 : vector<8x32xf32>
    %cst_50 = arith.constant 5.000000e-01 : f32
    %105 = vector.broadcast %cst_50 : f32 to vector<8x32xf32>
    %106 = arith.addf %104, %105 : vector<8x32xf32>
    %107 = vector.extract_strided_slice %101 {offsets = [0, 32], sizes = [8, 32], strides = [1, 1]} : vector<8x128xf32> to vector<8x32xf32>
    %cst_51 = arith.constant 5.000000e-01 : f32
    %108 = vector.broadcast %cst_51 : f32 to vector<8x32xf32>
    %109 = arith.mulf %108, %107 : vector<8x32xf32>
    %cst_52 = arith.constant 5.000000e-01 : f32
    %110 = vector.broadcast %cst_52 : f32 to vector<8x32xf32>
    %111 = arith.addf %109, %110 : vector<8x32xf32>
    %112 = vector.extract_strided_slice %101 {offsets = [0, 64], sizes = [8, 32], strides = [1, 1]} : vector<8x128xf32> to vector<8x32xf32>
    %113 = vector.extract_strided_slice %101 {offsets = [0, 96], sizes = [8, 32], strides = [1, 1]} : vector<8x128xf32> to vector<8x32xf32>
    %cst_53 = arith.constant 5.000000e-01 : f32
    %114 = vector.broadcast %cst_53 : f32 to vector<8x32xf32>
    %115 = arith.mulf %114, %113 : vector<8x32xf32>
    %cst_54 = arith.constant 5.000000e-01 : f32
    %116 = vector.broadcast %cst_54 : f32 to vector<8x32xf32>
    %117 = arith.addf %115, %116 : vector<8x32xf32>
    %118 = arith.mulf %111, %91 : vector<8x32xf32>
    %119 = arith.mulf %106, %112 : vector<8x32xf32>
    %120 = arith.addf %118, %119 : vector<8x32xf32>
    %121 = math.tanh %120 : vector<8x32xf32>
    %122 = arith.mulf %117, %121 : vector<8x32xf32>
    %c3 = arith.constant 3 : index
    %c0_55 = arith.constant 0 : index
    %c0_56 = arith.constant 0 : index
    %123 = vector.load %arg4[%c3, %c0_55, %c0_56] : memref<15x32x128xf32, #tpu.memory_space<vmem>>, vector<1x32x128xf32>
    %124 = vector.shape_cast %123 : vector<1x32x128xf32> to vector<32x128xf32>
    %cst_57 = arith.constant dense<0.000000e+00> : vector<8x128xf32>
    %125 = tpu.matmul %122, %124, %cst_57 {dimension_numbers = #tpu.dot_dimension_numbers<[1], [0], [0], [1], [0, 0, 1, 1], [], []>} : vector<8x32xf32>, vector<32x128xf32>, vector<8x128xf32> -> vector<8x128xf32>
    %126 = arith.addf %97, %125 : vector<8x128xf32>
    %c32 = arith.constant 32 : index
    %c0_58 = arith.constant 0 : index
    %127 = vector.load %arg7[%c32, %c0_58] : memref<120x128xf32, #tpu.memory_space<vmem>>, vector<8x128xf32>
    %cst_59 = arith.constant dense<0.000000e+00> : vector<8x128xf32>
    %128 = tpu.matmul %122, %7, %cst_59 {dimension_numbers = #tpu.dot_dimension_numbers<[1], [0], [0], [1], [0, 0, 1, 1], [], []>} : vector<8x32xf32>, vector<32x128xf32>, vector<8x128xf32> -> vector<8x128xf32>
    %129 = arith.addf %127, %128 : vector<8x128xf32>
    %130 = math.tanh %129 : vector<8x128xf32>
    %131 = vector.extract_strided_slice %130 {offsets = [0, 0], sizes = [8, 32], strides = [1, 1]} : vector<8x128xf32> to vector<8x32xf32>
    %cst_60 = arith.constant 5.000000e-01 : f32
    %132 = vector.broadcast %cst_60 : f32 to vector<8x32xf32>
    %133 = arith.mulf %132, %131 : vector<8x32xf32>
    %cst_61 = arith.constant 5.000000e-01 : f32
    %134 = vector.broadcast %cst_61 : f32 to vector<8x32xf32>
    %135 = arith.addf %133, %134 : vector<8x32xf32>
    %136 = vector.extract_strided_slice %130 {offsets = [0, 32], sizes = [8, 32], strides = [1, 1]} : vector<8x128xf32> to vector<8x32xf32>
    %cst_62 = arith.constant 5.000000e-01 : f32
    %137 = vector.broadcast %cst_62 : f32 to vector<8x32xf32>
    %138 = arith.mulf %137, %136 : vector<8x32xf32>
    %cst_63 = arith.constant 5.000000e-01 : f32
    %139 = vector.broadcast %cst_63 : f32 to vector<8x32xf32>
    %140 = arith.addf %138, %139 : vector<8x32xf32>
    %141 = vector.extract_strided_slice %130 {offsets = [0, 64], sizes = [8, 32], strides = [1, 1]} : vector<8x128xf32> to vector<8x32xf32>
    %142 = vector.extract_strided_slice %130 {offsets = [0, 96], sizes = [8, 32], strides = [1, 1]} : vector<8x128xf32> to vector<8x32xf32>
    %cst_64 = arith.constant 5.000000e-01 : f32
    %143 = vector.broadcast %cst_64 : f32 to vector<8x32xf32>
    %144 = arith.mulf %143, %142 : vector<8x32xf32>
    %cst_65 = arith.constant 5.000000e-01 : f32
    %145 = vector.broadcast %cst_65 : f32 to vector<8x32xf32>
    %146 = arith.addf %144, %145 : vector<8x32xf32>
    %147 = arith.mulf %140, %120 : vector<8x32xf32>
    %148 = arith.mulf %135, %141 : vector<8x32xf32>
    %149 = arith.addf %147, %148 : vector<8x32xf32>
    %150 = math.tanh %149 : vector<8x32xf32>
    %151 = arith.mulf %146, %150 : vector<8x32xf32>
    %c4 = arith.constant 4 : index
    %c0_66 = arith.constant 0 : index
    %c0_67 = arith.constant 0 : index
    %152 = vector.load %arg4[%c4, %c0_66, %c0_67] : memref<15x32x128xf32, #tpu.memory_space<vmem>>, vector<1x32x128xf32>
    %153 = vector.shape_cast %152 : vector<1x32x128xf32> to vector<32x128xf32>
    %cst_68 = arith.constant dense<0.000000e+00> : vector<8x128xf32>
    %154 = tpu.matmul %151, %153, %cst_68 {dimension_numbers = #tpu.dot_dimension_numbers<[1], [0], [0], [1], [0, 0, 1, 1], [], []>} : vector<8x32xf32>, vector<32x128xf32>, vector<8x128xf32> -> vector<8x128xf32>
    %155 = arith.addf %126, %154 : vector<8x128xf32>
    %c40 = arith.constant 40 : index
    %c0_69 = arith.constant 0 : index
    %156 = vector.load %arg7[%c40, %c0_69] : memref<120x128xf32, #tpu.memory_space<vmem>>, vector<8x128xf32>
    %cst_70 = arith.constant dense<0.000000e+00> : vector<8x128xf32>
    %157 = tpu.matmul %151, %7, %cst_70 {dimension_numbers = #tpu.dot_dimension_numbers<[1], [0], [0], [1], [0, 0, 1, 1], [], []>} : vector<8x32xf32>, vector<32x128xf32>, vector<8x128xf32> -> vector<8x128xf32>
    %158 = arith.addf %156, %157 : vector<8x128xf32>
    %159 = math.tanh %158 : vector<8x128xf32>
    %160 = vector.extract_strided_slice %159 {offsets = [0, 0], sizes = [8, 32], strides = [1, 1]} : vector<8x128xf32> to vector<8x32xf32>
    %cst_71 = arith.constant 5.000000e-01 : f32
    %161 = vector.broadcast %cst_71 : f32 to vector<8x32xf32>
    %162 = arith.mulf %161, %160 : vector<8x32xf32>
    %cst_72 = arith.constant 5.000000e-01 : f32
    %163 = vector.broadcast %cst_72 : f32 to vector<8x32xf32>
    %164 = arith.addf %162, %163 : vector<8x32xf32>
    %165 = vector.extract_strided_slice %159 {offsets = [0, 32], sizes = [8, 32], strides = [1, 1]} : vector<8x128xf32> to vector<8x32xf32>
    %cst_73 = arith.constant 5.000000e-01 : f32
    %166 = vector.broadcast %cst_73 : f32 to vector<8x32xf32>
    %167 = arith.mulf %166, %165 : vector<8x32xf32>
    %cst_74 = arith.constant 5.000000e-01 : f32
    %168 = vector.broadcast %cst_74 : f32 to vector<8x32xf32>
    %169 = arith.addf %167, %168 : vector<8x32xf32>
    %170 = vector.extract_strided_slice %159 {offsets = [0, 64], sizes = [8, 32], strides = [1, 1]} : vector<8x128xf32> to vector<8x32xf32>
    %171 = vector.extract_strided_slice %159 {offsets = [0, 96], sizes = [8, 32], strides = [1, 1]} : vector<8x128xf32> to vector<8x32xf32>
    %cst_75 = arith.constant 5.000000e-01 : f32
    %172 = vector.broadcast %cst_75 : f32 to vector<8x32xf32>
    %173 = arith.mulf %172, %171 : vector<8x32xf32>
    %cst_76 = arith.constant 5.000000e-01 : f32
    %174 = vector.broadcast %cst_76 : f32 to vector<8x32xf32>
    %175 = arith.addf %173, %174 : vector<8x32xf32>
    %176 = arith.mulf %169, %149 : vector<8x32xf32>
    %177 = arith.mulf %164, %170 : vector<8x32xf32>
    %178 = arith.addf %176, %177 : vector<8x32xf32>
    %179 = math.tanh %178 : vector<8x32xf32>
    %180 = arith.mulf %175, %179 : vector<8x32xf32>
    %c5 = arith.constant 5 : index
    %c0_77 = arith.constant 0 : index
    %c0_78 = arith.constant 0 : index
    %181 = vector.load %arg4[%c5, %c0_77, %c0_78] : memref<15x32x128xf32, #tpu.memory_space<vmem>>, vector<1x32x128xf32>
    %182 = vector.shape_cast %181 : vector<1x32x128xf32> to vector<32x128xf32>
    %cst_79 = arith.constant dense<0.000000e+00> : vector<8x128xf32>
    %183 = tpu.matmul %180, %182, %cst_79 {dimension_numbers = #tpu.dot_dimension_numbers<[1], [0], [0], [1], [0, 0, 1, 1], [], []>} : vector<8x32xf32>, vector<32x128xf32>, vector<8x128xf32> -> vector<8x128xf32>
    %184 = arith.addf %155, %183 : vector<8x128xf32>
    %c48 = arith.constant 48 : index
    %c0_80 = arith.constant 0 : index
    %185 = vector.load %arg7[%c48, %c0_80] : memref<120x128xf32, #tpu.memory_space<vmem>>, vector<8x128xf32>
    %cst_81 = arith.constant dense<0.000000e+00> : vector<8x128xf32>
    %186 = tpu.matmul %180, %7, %cst_81 {dimension_numbers = #tpu.dot_dimension_numbers<[1], [0], [0], [1], [0, 0, 1, 1], [], []>} : vector<8x32xf32>, vector<32x128xf32>, vector<8x128xf32> -> vector<8x128xf32>
    %187 = arith.addf %185, %186 : vector<8x128xf32>
    %188 = math.tanh %187 : vector<8x128xf32>
    %189 = vector.extract_strided_slice %188 {offsets = [0, 0], sizes = [8, 32], strides = [1, 1]} : vector<8x128xf32> to vector<8x32xf32>
    %cst_82 = arith.constant 5.000000e-01 : f32
    %190 = vector.broadcast %cst_82 : f32 to vector<8x32xf32>
    %191 = arith.mulf %190, %189 : vector<8x32xf32>
    %cst_83 = arith.constant 5.000000e-01 : f32
    %192 = vector.broadcast %cst_83 : f32 to vector<8x32xf32>
    %193 = arith.addf %191, %192 : vector<8x32xf32>
    %194 = vector.extract_strided_slice %188 {offsets = [0, 32], sizes = [8, 32], strides = [1, 1]} : vector<8x128xf32> to vector<8x32xf32>
    %cst_84 = arith.constant 5.000000e-01 : f32
    %195 = vector.broadcast %cst_84 : f32 to vector<8x32xf32>
    %196 = arith.mulf %195, %194 : vector<8x32xf32>
    %cst_85 = arith.constant 5.000000e-01 : f32
    %197 = vector.broadcast %cst_85 : f32 to vector<8x32xf32>
    %198 = arith.addf %196, %197 : vector<8x32xf32>
    %199 = vector.extract_strided_slice %188 {offsets = [0, 64], sizes = [8, 32], strides = [1, 1]} : vector<8x128xf32> to vector<8x32xf32>
    %200 = vector.extract_strided_slice %188 {offsets = [0, 96], sizes = [8, 32], strides = [1, 1]} : vector<8x128xf32> to vector<8x32xf32>
    %cst_86 = arith.constant 5.000000e-01 : f32
    %201 = vector.broadcast %cst_86 : f32 to vector<8x32xf32>
    %202 = arith.mulf %201, %200 : vector<8x32xf32>
    %cst_87 = arith.constant 5.000000e-01 : f32
    %203 = vector.broadcast %cst_87 : f32 to vector<8x32xf32>
    %204 = arith.addf %202, %203 : vector<8x32xf32>
    %205 = arith.mulf %198, %178 : vector<8x32xf32>
    %206 = arith.mulf %193, %199 : vector<8x32xf32>
    %207 = arith.addf %205, %206 : vector<8x32xf32>
    %208 = math.tanh %207 : vector<8x32xf32>
    %209 = arith.mulf %204, %208 : vector<8x32xf32>
    %c6 = arith.constant 6 : index
    %c0_88 = arith.constant 0 : index
    %c0_89 = arith.constant 0 : index
    %210 = vector.load %arg4[%c6, %c0_88, %c0_89] : memref<15x32x128xf32, #tpu.memory_space<vmem>>, vector<1x32x128xf32>
    %211 = vector.shape_cast %210 : vector<1x32x128xf32> to vector<32x128xf32>
    %cst_90 = arith.constant dense<0.000000e+00> : vector<8x128xf32>
    %212 = tpu.matmul %209, %211, %cst_90 {dimension_numbers = #tpu.dot_dimension_numbers<[1], [0], [0], [1], [0, 0, 1, 1], [], []>} : vector<8x32xf32>, vector<32x128xf32>, vector<8x128xf32> -> vector<8x128xf32>
    %213 = arith.addf %184, %212 : vector<8x128xf32>
    %c56 = arith.constant 56 : index
    %c0_91 = arith.constant 0 : index
    %214 = vector.load %arg7[%c56, %c0_91] : memref<120x128xf32, #tpu.memory_space<vmem>>, vector<8x128xf32>
    %cst_92 = arith.constant dense<0.000000e+00> : vector<8x128xf32>
    %215 = tpu.matmul %209, %7, %cst_92 {dimension_numbers = #tpu.dot_dimension_numbers<[1], [0], [0], [1], [0, 0, 1, 1], [], []>} : vector<8x32xf32>, vector<32x128xf32>, vector<8x128xf32> -> vector<8x128xf32>
    %216 = arith.addf %214, %215 : vector<8x128xf32>
    %217 = math.tanh %216 : vector<8x128xf32>
    %218 = vector.extract_strided_slice %217 {offsets = [0, 0], sizes = [8, 32], strides = [1, 1]} : vector<8x128xf32> to vector<8x32xf32>
    %cst_93 = arith.constant 5.000000e-01 : f32
    %219 = vector.broadcast %cst_93 : f32 to vector<8x32xf32>
    %220 = arith.mulf %219, %218 : vector<8x32xf32>
    %cst_94 = arith.constant 5.000000e-01 : f32
    %221 = vector.broadcast %cst_94 : f32 to vector<8x32xf32>
    %222 = arith.addf %220, %221 : vector<8x32xf32>
    %223 = vector.extract_strided_slice %217 {offsets = [0, 32], sizes = [8, 32], strides = [1, 1]} : vector<8x128xf32> to vector<8x32xf32>
    %cst_95 = arith.constant 5.000000e-01 : f32
    %224 = vector.broadcast %cst_95 : f32 to vector<8x32xf32>
    %225 = arith.mulf %224, %223 : vector<8x32xf32>
    %cst_96 = arith.constant 5.000000e-01 : f32
    %226 = vector.broadcast %cst_96 : f32 to vector<8x32xf32>
    %227 = arith.addf %225, %226 : vector<8x32xf32>
    %228 = vector.extract_strided_slice %217 {offsets = [0, 64], sizes = [8, 32], strides = [1, 1]} : vector<8x128xf32> to vector<8x32xf32>
    %229 = vector.extract_strided_slice %217 {offsets = [0, 96], sizes = [8, 32], strides = [1, 1]} : vector<8x128xf32> to vector<8x32xf32>
    %cst_97 = arith.constant 5.000000e-01 : f32
    %230 = vector.broadcast %cst_97 : f32 to vector<8x32xf32>
    %231 = arith.mulf %230, %229 : vector<8x32xf32>
    %cst_98 = arith.constant 5.000000e-01 : f32
    %232 = vector.broadcast %cst_98 : f32 to vector<8x32xf32>
    %233 = arith.addf %231, %232 : vector<8x32xf32>
    %234 = arith.mulf %227, %207 : vector<8x32xf32>
    %235 = arith.mulf %222, %228 : vector<8x32xf32>
    %236 = arith.addf %234, %235 : vector<8x32xf32>
    %237 = math.tanh %236 : vector<8x32xf32>
    %238 = arith.mulf %233, %237 : vector<8x32xf32>
    %c7 = arith.constant 7 : index
    %c0_99 = arith.constant 0 : index
    %c0_100 = arith.constant 0 : index
    %239 = vector.load %arg4[%c7, %c0_99, %c0_100] : memref<15x32x128xf32, #tpu.memory_space<vmem>>, vector<1x32x128xf32>
    %240 = vector.shape_cast %239 : vector<1x32x128xf32> to vector<32x128xf32>
    %cst_101 = arith.constant dense<0.000000e+00> : vector<8x128xf32>
    %241 = tpu.matmul %238, %240, %cst_101 {dimension_numbers = #tpu.dot_dimension_numbers<[1], [0], [0], [1], [0, 0, 1, 1], [], []>} : vector<8x32xf32>, vector<32x128xf32>, vector<8x128xf32> -> vector<8x128xf32>
    %242 = arith.addf %213, %241 : vector<8x128xf32>
    %c64 = arith.constant 64 : index
    %c0_102 = arith.constant 0 : index
    %243 = vector.load %arg7[%c64, %c0_102] : memref<120x128xf32, #tpu.memory_space<vmem>>, vector<8x128xf32>
    %cst_103 = arith.constant dense<0.000000e+00> : vector<8x128xf32>
    %244 = tpu.matmul %238, %7, %cst_103 {dimension_numbers = #tpu.dot_dimension_numbers<[1], [0], [0], [1], [0, 0, 1, 1], [], []>} : vector<8x32xf32>, vector<32x128xf32>, vector<8x128xf32> -> vector<8x128xf32>
    %245 = arith.addf %243, %244 : vector<8x128xf32>
    %246 = math.tanh %245 : vector<8x128xf32>
    %247 = vector.extract_strided_slice %246 {offsets = [0, 0], sizes = [8, 32], strides = [1, 1]} : vector<8x128xf32> to vector<8x32xf32>
    %cst_104 = arith.constant 5.000000e-01 : f32
    %248 = vector.broadcast %cst_104 : f32 to vector<8x32xf32>
    %249 = arith.mulf %248, %247 : vector<8x32xf32>
    %cst_105 = arith.constant 5.000000e-01 : f32
    %250 = vector.broadcast %cst_105 : f32 to vector<8x32xf32>
    %251 = arith.addf %249, %250 : vector<8x32xf32>
    %252 = vector.extract_strided_slice %246 {offsets = [0, 32], sizes = [8, 32], strides = [1, 1]} : vector<8x128xf32> to vector<8x32xf32>
    %cst_106 = arith.constant 5.000000e-01 : f32
    %253 = vector.broadcast %cst_106 : f32 to vector<8x32xf32>
    %254 = arith.mulf %253, %252 : vector<8x32xf32>
    %cst_107 = arith.constant 5.000000e-01 : f32
    %255 = vector.broadcast %cst_107 : f32 to vector<8x32xf32>
    %256 = arith.addf %254, %255 : vector<8x32xf32>
    %257 = vector.extract_strided_slice %246 {offsets = [0, 64], sizes = [8, 32], strides = [1, 1]} : vector<8x128xf32> to vector<8x32xf32>
    %258 = vector.extract_strided_slice %246 {offsets = [0, 96], sizes = [8, 32], strides = [1, 1]} : vector<8x128xf32> to vector<8x32xf32>
    %cst_108 = arith.constant 5.000000e-01 : f32
    %259 = vector.broadcast %cst_108 : f32 to vector<8x32xf32>
    %260 = arith.mulf %259, %258 : vector<8x32xf32>
    %cst_109 = arith.constant 5.000000e-01 : f32
    %261 = vector.broadcast %cst_109 : f32 to vector<8x32xf32>
    %262 = arith.addf %260, %261 : vector<8x32xf32>
    %263 = arith.mulf %256, %236 : vector<8x32xf32>
    %264 = arith.mulf %251, %257 : vector<8x32xf32>
    %265 = arith.addf %263, %264 : vector<8x32xf32>
    %266 = math.tanh %265 : vector<8x32xf32>
    %267 = arith.mulf %262, %266 : vector<8x32xf32>
    %c8_110 = arith.constant 8 : index
    %c0_111 = arith.constant 0 : index
    %c0_112 = arith.constant 0 : index
    %268 = vector.load %arg4[%c8_110, %c0_111, %c0_112] : memref<15x32x128xf32, #tpu.memory_space<vmem>>, vector<1x32x128xf32>
    %269 = vector.shape_cast %268 : vector<1x32x128xf32> to vector<32x128xf32>
    %cst_113 = arith.constant dense<0.000000e+00> : vector<8x128xf32>
    %270 = tpu.matmul %267, %269, %cst_113 {dimension_numbers = #tpu.dot_dimension_numbers<[1], [0], [0], [1], [0, 0, 1, 1], [], []>} : vector<8x32xf32>, vector<32x128xf32>, vector<8x128xf32> -> vector<8x128xf32>
    %271 = arith.addf %242, %270 : vector<8x128xf32>
    %c72 = arith.constant 72 : index
    %c0_114 = arith.constant 0 : index
    %272 = vector.load %arg7[%c72, %c0_114] : memref<120x128xf32, #tpu.memory_space<vmem>>, vector<8x128xf32>
    %cst_115 = arith.constant dense<0.000000e+00> : vector<8x128xf32>
    %273 = tpu.matmul %267, %7, %cst_115 {dimension_numbers = #tpu.dot_dimension_numbers<[1], [0], [0], [1], [0, 0, 1, 1], [], []>} : vector<8x32xf32>, vector<32x128xf32>, vector<8x128xf32> -> vector<8x128xf32>
    %274 = arith.addf %272, %273 : vector<8x128xf32>
    %275 = math.tanh %274 : vector<8x128xf32>
    %276 = vector.extract_strided_slice %275 {offsets = [0, 0], sizes = [8, 32], strides = [1, 1]} : vector<8x128xf32> to vector<8x32xf32>
    %cst_116 = arith.constant 5.000000e-01 : f32
    %277 = vector.broadcast %cst_116 : f32 to vector<8x32xf32>
    %278 = arith.mulf %277, %276 : vector<8x32xf32>
    %cst_117 = arith.constant 5.000000e-01 : f32
    %279 = vector.broadcast %cst_117 : f32 to vector<8x32xf32>
    %280 = arith.addf %278, %279 : vector<8x32xf32>
    %281 = vector.extract_strided_slice %275 {offsets = [0, 32], sizes = [8, 32], strides = [1, 1]} : vector<8x128xf32> to vector<8x32xf32>
    %cst_118 = arith.constant 5.000000e-01 : f32
    %282 = vector.broadcast %cst_118 : f32 to vector<8x32xf32>
    %283 = arith.mulf %282, %281 : vector<8x32xf32>
    %cst_119 = arith.constant 5.000000e-01 : f32
    %284 = vector.broadcast %cst_119 : f32 to vector<8x32xf32>
    %285 = arith.addf %283, %284 : vector<8x32xf32>
    %286 = vector.extract_strided_slice %275 {offsets = [0, 64], sizes = [8, 32], strides = [1, 1]} : vector<8x128xf32> to vector<8x32xf32>
    %287 = vector.extract_strided_slice %275 {offsets = [0, 96], sizes = [8, 32], strides = [1, 1]} : vector<8x128xf32> to vector<8x32xf32>
    %cst_120 = arith.constant 5.000000e-01 : f32
    %288 = vector.broadcast %cst_120 : f32 to vector<8x32xf32>
    %289 = arith.mulf %288, %287 : vector<8x32xf32>
    %cst_121 = arith.constant 5.000000e-01 : f32
    %290 = vector.broadcast %cst_121 : f32 to vector<8x32xf32>
    %291 = arith.addf %289, %290 : vector<8x32xf32>
    %292 = arith.mulf %285, %265 : vector<8x32xf32>
    %293 = arith.mulf %280, %286 : vector<8x32xf32>
    %294 = arith.addf %292, %293 : vector<8x32xf32>
    %295 = math.tanh %294 : vector<8x32xf32>
    %296 = arith.mulf %291, %295 : vector<8x32xf32>
    %c9 = arith.constant 9 : index
    %c0_122 = arith.constant 0 : index
    %c0_123 = arith.constant 0 : index
    %297 = vector.load %arg4[%c9, %c0_122, %c0_123] : memref<15x32x128xf32, #tpu.memory_space<vmem>>, vector<1x32x128xf32>
    %298 = vector.shape_cast %297 : vector<1x32x128xf32> to vector<32x128xf32>
    %cst_124 = arith.constant dense<0.000000e+00> : vector<8x128xf32>
    %299 = tpu.matmul %296, %298, %cst_124 {dimension_numbers = #tpu.dot_dimension_numbers<[1], [0], [0], [1], [0, 0, 1, 1], [], []>} : vector<8x32xf32>, vector<32x128xf32>, vector<8x128xf32> -> vector<8x128xf32>
    %300 = arith.addf %271, %299 : vector<8x128xf32>
    %c80 = arith.constant 80 : index
    %c0_125 = arith.constant 0 : index
    %301 = vector.load %arg7[%c80, %c0_125] : memref<120x128xf32, #tpu.memory_space<vmem>>, vector<8x128xf32>
    %cst_126 = arith.constant dense<0.000000e+00> : vector<8x128xf32>
    %302 = tpu.matmul %296, %7, %cst_126 {dimension_numbers = #tpu.dot_dimension_numbers<[1], [0], [0], [1], [0, 0, 1, 1], [], []>} : vector<8x32xf32>, vector<32x128xf32>, vector<8x128xf32> -> vector<8x128xf32>
    %303 = arith.addf %301, %302 : vector<8x128xf32>
    %304 = math.tanh %303 : vector<8x128xf32>
    %305 = vector.extract_strided_slice %304 {offsets = [0, 0], sizes = [8, 32], strides = [1, 1]} : vector<8x128xf32> to vector<8x32xf32>
    %cst_127 = arith.constant 5.000000e-01 : f32
    %306 = vector.broadcast %cst_127 : f32 to vector<8x32xf32>
    %307 = arith.mulf %306, %305 : vector<8x32xf32>
    %cst_128 = arith.constant 5.000000e-01 : f32
    %308 = vector.broadcast %cst_128 : f32 to vector<8x32xf32>
    %309 = arith.addf %307, %308 : vector<8x32xf32>
    %310 = vector.extract_strided_slice %304 {offsets = [0, 32], sizes = [8, 32], strides = [1, 1]} : vector<8x128xf32> to vector<8x32xf32>
    %cst_129 = arith.constant 5.000000e-01 : f32
    %311 = vector.broadcast %cst_129 : f32 to vector<8x32xf32>
    %312 = arith.mulf %311, %310 : vector<8x32xf32>
    %cst_130 = arith.constant 5.000000e-01 : f32
    %313 = vector.broadcast %cst_130 : f32 to vector<8x32xf32>
    %314 = arith.addf %312, %313 : vector<8x32xf32>
    %315 = vector.extract_strided_slice %304 {offsets = [0, 64], sizes = [8, 32], strides = [1, 1]} : vector<8x128xf32> to vector<8x32xf32>
    %316 = vector.extract_strided_slice %304 {offsets = [0, 96], sizes = [8, 32], strides = [1, 1]} : vector<8x128xf32> to vector<8x32xf32>
    %cst_131 = arith.constant 5.000000e-01 : f32
    %317 = vector.broadcast %cst_131 : f32 to vector<8x32xf32>
    %318 = arith.mulf %317, %316 : vector<8x32xf32>
    %cst_132 = arith.constant 5.000000e-01 : f32
    %319 = vector.broadcast %cst_132 : f32 to vector<8x32xf32>
    %320 = arith.addf %318, %319 : vector<8x32xf32>
    %321 = arith.mulf %314, %294 : vector<8x32xf32>
    %322 = arith.mulf %309, %315 : vector<8x32xf32>
    %323 = arith.addf %321, %322 : vector<8x32xf32>
    %324 = math.tanh %323 : vector<8x32xf32>
    %325 = arith.mulf %320, %324 : vector<8x32xf32>
    %c10 = arith.constant 10 : index
    %c0_133 = arith.constant 0 : index
    %c0_134 = arith.constant 0 : index
    %326 = vector.load %arg4[%c10, %c0_133, %c0_134] : memref<15x32x128xf32, #tpu.memory_space<vmem>>, vector<1x32x128xf32>
    %327 = vector.shape_cast %326 : vector<1x32x128xf32> to vector<32x128xf32>
    %cst_135 = arith.constant dense<0.000000e+00> : vector<8x128xf32>
    %328 = tpu.matmul %325, %327, %cst_135 {dimension_numbers = #tpu.dot_dimension_numbers<[1], [0], [0], [1], [0, 0, 1, 1], [], []>} : vector<8x32xf32>, vector<32x128xf32>, vector<8x128xf32> -> vector<8x128xf32>
    %329 = arith.addf %300, %328 : vector<8x128xf32>
    %c88 = arith.constant 88 : index
    %c0_136 = arith.constant 0 : index
    %330 = vector.load %arg7[%c88, %c0_136] : memref<120x128xf32, #tpu.memory_space<vmem>>, vector<8x128xf32>
    %cst_137 = arith.constant dense<0.000000e+00> : vector<8x128xf32>
    %331 = tpu.matmul %325, %7, %cst_137 {dimension_numbers = #tpu.dot_dimension_numbers<[1], [0], [0], [1], [0, 0, 1, 1], [], []>} : vector<8x32xf32>, vector<32x128xf32>, vector<8x128xf32> -> vector<8x128xf32>
    %332 = arith.addf %330, %331 : vector<8x128xf32>
    %333 = math.tanh %332 : vector<8x128xf32>
    %334 = vector.extract_strided_slice %333 {offsets = [0, 0], sizes = [8, 32], strides = [1, 1]} : vector<8x128xf32> to vector<8x32xf32>
    %cst_138 = arith.constant 5.000000e-01 : f32
    %335 = vector.broadcast %cst_138 : f32 to vector<8x32xf32>
    %336 = arith.mulf %335, %334 : vector<8x32xf32>
    %cst_139 = arith.constant 5.000000e-01 : f32
    %337 = vector.broadcast %cst_139 : f32 to vector<8x32xf32>
    %338 = arith.addf %336, %337 : vector<8x32xf32>
    %339 = vector.extract_strided_slice %333 {offsets = [0, 32], sizes = [8, 32], strides = [1, 1]} : vector<8x128xf32> to vector<8x32xf32>
    %cst_140 = arith.constant 5.000000e-01 : f32
    %340 = vector.broadcast %cst_140 : f32 to vector<8x32xf32>
    %341 = arith.mulf %340, %339 : vector<8x32xf32>
    %cst_141 = arith.constant 5.000000e-01 : f32
    %342 = vector.broadcast %cst_141 : f32 to vector<8x32xf32>
    %343 = arith.addf %341, %342 : vector<8x32xf32>
    %344 = vector.extract_strided_slice %333 {offsets = [0, 64], sizes = [8, 32], strides = [1, 1]} : vector<8x128xf32> to vector<8x32xf32>
    %345 = vector.extract_strided_slice %333 {offsets = [0, 96], sizes = [8, 32], strides = [1, 1]} : vector<8x128xf32> to vector<8x32xf32>
    %cst_142 = arith.constant 5.000000e-01 : f32
    %346 = vector.broadcast %cst_142 : f32 to vector<8x32xf32>
    %347 = arith.mulf %346, %345 : vector<8x32xf32>
    %cst_143 = arith.constant 5.000000e-01 : f32
    %348 = vector.broadcast %cst_143 : f32 to vector<8x32xf32>
    %349 = arith.addf %347, %348 : vector<8x32xf32>
    %350 = arith.mulf %343, %323 : vector<8x32xf32>
    %351 = arith.mulf %338, %344 : vector<8x32xf32>
    %352 = arith.addf %350, %351 : vector<8x32xf32>
    %353 = math.tanh %352 : vector<8x32xf32>
    %354 = arith.mulf %349, %353 : vector<8x32xf32>
    %c11 = arith.constant 11 : index
    %c0_144 = arith.constant 0 : index
    %c0_145 = arith.constant 0 : index
    %355 = vector.load %arg4[%c11, %c0_144, %c0_145] : memref<15x32x128xf32, #tpu.memory_space<vmem>>, vector<1x32x128xf32>
    %356 = vector.shape_cast %355 : vector<1x32x128xf32> to vector<32x128xf32>
    %cst_146 = arith.constant dense<0.000000e+00> : vector<8x128xf32>
    %357 = tpu.matmul %354, %356, %cst_146 {dimension_numbers = #tpu.dot_dimension_numbers<[1], [0], [0], [1], [0, 0, 1, 1], [], []>} : vector<8x32xf32>, vector<32x128xf32>, vector<8x128xf32> -> vector<8x128xf32>
    %358 = arith.addf %329, %357 : vector<8x128xf32>
    %c96 = arith.constant 96 : index
    %c0_147 = arith.constant 0 : index
    %359 = vector.load %arg7[%c96, %c0_147] : memref<120x128xf32, #tpu.memory_space<vmem>>, vector<8x128xf32>
    %cst_148 = arith.constant dense<0.000000e+00> : vector<8x128xf32>
    %360 = tpu.matmul %354, %7, %cst_148 {dimension_numbers = #tpu.dot_dimension_numbers<[1], [0], [0], [1], [0, 0, 1, 1], [], []>} : vector<8x32xf32>, vector<32x128xf32>, vector<8x128xf32> -> vector<8x128xf32>
    %361 = arith.addf %359, %360 : vector<8x128xf32>
    %362 = math.tanh %361 : vector<8x128xf32>
    %363 = vector.extract_strided_slice %362 {offsets = [0, 0], sizes = [8, 32], strides = [1, 1]} : vector<8x128xf32> to vector<8x32xf32>
    %cst_149 = arith.constant 5.000000e-01 : f32
    %364 = vector.broadcast %cst_149 : f32 to vector<8x32xf32>
    %365 = arith.mulf %364, %363 : vector<8x32xf32>
    %cst_150 = arith.constant 5.000000e-01 : f32
    %366 = vector.broadcast %cst_150 : f32 to vector<8x32xf32>
    %367 = arith.addf %365, %366 : vector<8x32xf32>
    %368 = vector.extract_strided_slice %362 {offsets = [0, 32], sizes = [8, 32], strides = [1, 1]} : vector<8x128xf32> to vector<8x32xf32>
    %cst_151 = arith.constant 5.000000e-01 : f32
    %369 = vector.broadcast %cst_151 : f32 to vector<8x32xf32>
    %370 = arith.mulf %369, %368 : vector<8x32xf32>
    %cst_152 = arith.constant 5.000000e-01 : f32
    %371 = vector.broadcast %cst_152 : f32 to vector<8x32xf32>
    %372 = arith.addf %370, %371 : vector<8x32xf32>
    %373 = vector.extract_strided_slice %362 {offsets = [0, 64], sizes = [8, 32], strides = [1, 1]} : vector<8x128xf32> to vector<8x32xf32>
    %374 = vector.extract_strided_slice %362 {offsets = [0, 96], sizes = [8, 32], strides = [1, 1]} : vector<8x128xf32> to vector<8x32xf32>
    %cst_153 = arith.constant 5.000000e-01 : f32
    %375 = vector.broadcast %cst_153 : f32 to vector<8x32xf32>
    %376 = arith.mulf %375, %374 : vector<8x32xf32>
    %cst_154 = arith.constant 5.000000e-01 : f32
    %377 = vector.broadcast %cst_154 : f32 to vector<8x32xf32>
    %378 = arith.addf %376, %377 : vector<8x32xf32>
    %379 = arith.mulf %372, %352 : vector<8x32xf32>
    %380 = arith.mulf %367, %373 : vector<8x32xf32>
    %381 = arith.addf %379, %380 : vector<8x32xf32>
    %382 = math.tanh %381 : vector<8x32xf32>
    %383 = arith.mulf %378, %382 : vector<8x32xf32>
    %c12 = arith.constant 12 : index
    %c0_155 = arith.constant 0 : index
    %c0_156 = arith.constant 0 : index
    %384 = vector.load %arg4[%c12, %c0_155, %c0_156] : memref<15x32x128xf32, #tpu.memory_space<vmem>>, vector<1x32x128xf32>
    %385 = vector.shape_cast %384 : vector<1x32x128xf32> to vector<32x128xf32>
    %cst_157 = arith.constant dense<0.000000e+00> : vector<8x128xf32>
    %386 = tpu.matmul %383, %385, %cst_157 {dimension_numbers = #tpu.dot_dimension_numbers<[1], [0], [0], [1], [0, 0, 1, 1], [], []>} : vector<8x32xf32>, vector<32x128xf32>, vector<8x128xf32> -> vector<8x128xf32>
    %387 = arith.addf %358, %386 : vector<8x128xf32>
    %c104 = arith.constant 104 : index
    %c0_158 = arith.constant 0 : index
    %388 = vector.load %arg7[%c104, %c0_158] : memref<120x128xf32, #tpu.memory_space<vmem>>, vector<8x128xf32>
    %cst_159 = arith.constant dense<0.000000e+00> : vector<8x128xf32>
    %389 = tpu.matmul %383, %7, %cst_159 {dimension_numbers = #tpu.dot_dimension_numbers<[1], [0], [0], [1], [0, 0, 1, 1], [], []>} : vector<8x32xf32>, vector<32x128xf32>, vector<8x128xf32> -> vector<8x128xf32>
    %390 = arith.addf %388, %389 : vector<8x128xf32>
    %391 = math.tanh %390 : vector<8x128xf32>
    %392 = vector.extract_strided_slice %391 {offsets = [0, 0], sizes = [8, 32], strides = [1, 1]} : vector<8x128xf32> to vector<8x32xf32>
    %cst_160 = arith.constant 5.000000e-01 : f32
    %393 = vector.broadcast %cst_160 : f32 to vector<8x32xf32>
    %394 = arith.mulf %393, %392 : vector<8x32xf32>
    %cst_161 = arith.constant 5.000000e-01 : f32
    %395 = vector.broadcast %cst_161 : f32 to vector<8x32xf32>
    %396 = arith.addf %394, %395 : vector<8x32xf32>
    %397 = vector.extract_strided_slice %391 {offsets = [0, 32], sizes = [8, 32], strides = [1, 1]} : vector<8x128xf32> to vector<8x32xf32>
    %cst_162 = arith.constant 5.000000e-01 : f32
    %398 = vector.broadcast %cst_162 : f32 to vector<8x32xf32>
    %399 = arith.mulf %398, %397 : vector<8x32xf32>
    %cst_163 = arith.constant 5.000000e-01 : f32
    %400 = vector.broadcast %cst_163 : f32 to vector<8x32xf32>
    %401 = arith.addf %399, %400 : vector<8x32xf32>
    %402 = vector.extract_strided_slice %391 {offsets = [0, 64], sizes = [8, 32], strides = [1, 1]} : vector<8x128xf32> to vector<8x32xf32>
    %403 = vector.extract_strided_slice %391 {offsets = [0, 96], sizes = [8, 32], strides = [1, 1]} : vector<8x128xf32> to vector<8x32xf32>
    %cst_164 = arith.constant 5.000000e-01 : f32
    %404 = vector.broadcast %cst_164 : f32 to vector<8x32xf32>
    %405 = arith.mulf %404, %403 : vector<8x32xf32>
    %cst_165 = arith.constant 5.000000e-01 : f32
    %406 = vector.broadcast %cst_165 : f32 to vector<8x32xf32>
    %407 = arith.addf %405, %406 : vector<8x32xf32>
    %408 = arith.mulf %401, %381 : vector<8x32xf32>
    %409 = arith.mulf %396, %402 : vector<8x32xf32>
    %410 = arith.addf %408, %409 : vector<8x32xf32>
    %411 = math.tanh %410 : vector<8x32xf32>
    %412 = arith.mulf %407, %411 : vector<8x32xf32>
    %c13 = arith.constant 13 : index
    %c0_166 = arith.constant 0 : index
    %c0_167 = arith.constant 0 : index
    %413 = vector.load %arg4[%c13, %c0_166, %c0_167] : memref<15x32x128xf32, #tpu.memory_space<vmem>>, vector<1x32x128xf32>
    %414 = vector.shape_cast %413 : vector<1x32x128xf32> to vector<32x128xf32>
    %cst_168 = arith.constant dense<0.000000e+00> : vector<8x128xf32>
    %415 = tpu.matmul %412, %414, %cst_168 {dimension_numbers = #tpu.dot_dimension_numbers<[1], [0], [0], [1], [0, 0, 1, 1], [], []>} : vector<8x32xf32>, vector<32x128xf32>, vector<8x128xf32> -> vector<8x128xf32>
    %416 = arith.addf %387, %415 : vector<8x128xf32>
    %c112 = arith.constant 112 : index
    %c0_169 = arith.constant 0 : index
    %417 = vector.load %arg7[%c112, %c0_169] : memref<120x128xf32, #tpu.memory_space<vmem>>, vector<8x128xf32>
    %cst_170 = arith.constant dense<0.000000e+00> : vector<8x128xf32>
    %418 = tpu.matmul %412, %7, %cst_170 {dimension_numbers = #tpu.dot_dimension_numbers<[1], [0], [0], [1], [0, 0, 1, 1], [], []>} : vector<8x32xf32>, vector<32x128xf32>, vector<8x128xf32> -> vector<8x128xf32>
    %419 = arith.addf %417, %418 : vector<8x128xf32>
    %420 = math.tanh %419 : vector<8x128xf32>
    %421 = vector.extract_strided_slice %420 {offsets = [0, 0], sizes = [8, 32], strides = [1, 1]} : vector<8x128xf32> to vector<8x32xf32>
    %cst_171 = arith.constant 5.000000e-01 : f32
    %422 = vector.broadcast %cst_171 : f32 to vector<8x32xf32>
    %423 = arith.mulf %422, %421 : vector<8x32xf32>
    %cst_172 = arith.constant 5.000000e-01 : f32
    %424 = vector.broadcast %cst_172 : f32 to vector<8x32xf32>
    %425 = arith.addf %423, %424 : vector<8x32xf32>
    %426 = vector.extract_strided_slice %420 {offsets = [0, 32], sizes = [8, 32], strides = [1, 1]} : vector<8x128xf32> to vector<8x32xf32>
    %cst_173 = arith.constant 5.000000e-01 : f32
    %427 = vector.broadcast %cst_173 : f32 to vector<8x32xf32>
    %428 = arith.mulf %427, %426 : vector<8x32xf32>
    %cst_174 = arith.constant 5.000000e-01 : f32
    %429 = vector.broadcast %cst_174 : f32 to vector<8x32xf32>
    %430 = arith.addf %428, %429 : vector<8x32xf32>
    %431 = vector.extract_strided_slice %420 {offsets = [0, 64], sizes = [8, 32], strides = [1, 1]} : vector<8x128xf32> to vector<8x32xf32>
    %432 = vector.extract_strided_slice %420 {offsets = [0, 96], sizes = [8, 32], strides = [1, 1]} : vector<8x128xf32> to vector<8x32xf32>
    %cst_175 = arith.constant 5.000000e-01 : f32
    %433 = vector.broadcast %cst_175 : f32 to vector<8x32xf32>
    %434 = arith.mulf %433, %432 : vector<8x32xf32>
    %cst_176 = arith.constant 5.000000e-01 : f32
    %435 = vector.broadcast %cst_176 : f32 to vector<8x32xf32>
    %436 = arith.addf %434, %435 : vector<8x32xf32>
    %437 = arith.mulf %430, %410 : vector<8x32xf32>
    %438 = arith.mulf %425, %431 : vector<8x32xf32>
    %439 = arith.addf %437, %438 : vector<8x32xf32>
    %440 = math.tanh %439 : vector<8x32xf32>
    %441 = arith.mulf %436, %440 : vector<8x32xf32>
    %c14 = arith.constant 14 : index
    %c0_177 = arith.constant 0 : index
    %c0_178 = arith.constant 0 : index
    %442 = vector.load %arg4[%c14, %c0_177, %c0_178] : memref<15x32x128xf32, #tpu.memory_space<vmem>>, vector<1x32x128xf32>
    %443 = vector.shape_cast %442 : vector<1x32x128xf32> to vector<32x128xf32>
    %cst_179 = arith.constant dense<0.000000e+00> : vector<8x128xf32>
    %444 = tpu.matmul %441, %443, %cst_179 {dimension_numbers = #tpu.dot_dimension_numbers<[1], [0], [0], [1], [0, 0, 1, 1], [], []>} : vector<8x32xf32>, vector<32x128xf32>, vector<8x128xf32> -> vector<8x128xf32>
    %445 = arith.addf %416, %444 : vector<8x128xf32>
    %c0_180 = arith.constant 0 : index
    %c0_181 = arith.constant 0 : index
    %446 = vector.load %arg5[%c0_180, %c0_181] : memref<1x128xf32, #tpu.memory_space<vmem>>, vector<1x128xf32>
    %447 = vector.broadcast %446 : vector<1x128xf32> to vector<8x128xf32>
    %448 = arith.addf %445, %447 : vector<8x128xf32>
    %c0_182 = arith.constant 0 : index
    %c0_183 = arith.constant 0 : index
    %449 = vector.load %arg6[%c0_182, %c0_183] : memref<8x128xf32, #tpu.memory_space<vmem>>, vector<8x128xf32>
    tpu.vector_store %arg6[%c0_182, %c0_183], %448 {strides = array<i32>} : memref<8x128xf32, #tpu.memory_space<vmem>>, vector<8x128xf32>,
    return
  }
}

</mosaic_0001>

<bundles_post_ra>
// kernel: tpu_custom_call.1
= control target key start
LH: loop header
LB: loop body
LE: loop exit
PB: predicated region body
PF: predicated region fallthrough
CT: control target
= control target key end

     0   :  { %11 = vsyncpa [#allocation4], 0  ;;  %s1836_s0 = inlined_call_operand.vmem [shape: f32[120,8], index: 0, kind: input, shape index: {}]   ;;  %s1837_s1 = inlined_call_operand.vmem [shape: f32[8,128], index: 1, kind: input, shape index: {}]   ;;  %s1838_s2 = inlined_call_operand.vmem [shape: f32[32,128], index: 2, kind: input, shape index: {}]   ;;  %s1839_s3 = inlined_call_operand.vmem [shape: f32[1,128], index: 3, kind: input, shape index: {}]   ;;  %s1840_s4 = inlined_call_operand.hbm [shape: f32[15,32,128], index: 4, kind: input, shape index: {}]   ;;  %s1841_s5 = inlined_call_operand.vmem [shape: f32[1,128], index: 5, kind: input, shape index: {}]   ;;  %s1842_s6 = inlined_call_operand.hbm [shape: f32[8,128], index: 6, kind: output, shape index: {}]  }
   0x1   :  { %12 = vsyncpa [#allocation5], 0  ;;  %s25_s23 = sshll.u32 %s1840_s4, 4  ;;  %s1478_s24 = smov [#allocation3]   ;;  %s26_s23 = int_to_ptr.hbm [resolvable:$true] %s25_s23 }
   0x2   :  { %s27_s25 = sshll.u32 %s1478_s24, 4  ;;  %s1479_s26 = smov 128   ;;  %s28_s25 = int_to_ptr.vmem [resolvable:$true] %s27_s25 }
   0x3   :  { %s1480_s27 = smov 8  }
   0x4   :  { %33 = dma.hbm_to_vmem [thread:$0]  %s26_s23, 7680, %s28_s25, [#allocation4], %s1479_s26, %s1479_s26, %s1480_s27  }
   0x5   :  { %1474 = dma.done.wait [#allocation4], 7680  }
   0x6   :  { %1475 = vsyncadd [#allocation4], 4294959616  ;;  %vm60_vm0 = vcmask 64512   ;;  %v55_v0 = vld [vmem:[%s1837_s1] sm:$0xff]  ;;  %v1532_v2 = vld [vmem:[%s1838_s2 + $0x18] sm:$0xff]  ;;  %v1481_v7 = vmov 0.0  }
   0x7   :  { %v52_v1 = vld [vmem:[%s1836_s0 + $0x60] sm:$0xff]  ;;  %1350 = vmatpush.msra.mxu1 %v55_v0  ;;  %121 = vmatpush.msra.mxu0 %v55_v0  ;;  %v1541_v4 = vld [vmem:[%s1838_s2 + $0x10] sm:$0xff]  ;;  %v1548_v5 = vld [vmem:[%s1838_s2 + $0x8] sm:$0xff]  ;;  %s1482_s18 = smov 64   ;;  %s1483_s19 = smov 32   ;;  %vm188_vm1 = vcmask 261120  }
   0x8   :  { %v40_v3 = vld [vmem:[%s1836_s0] sm:$0xff]  ;;  %1318 = vmatmul.msk.f32.vlgmr.msra.gmra.mxu1 %vm60_vm0, %v52_v1  ;;  %1351 = vmatpush.msra.mxu2 %v55_v0  ;;  %v53_v23 = vld [vmem:[%s1836_s0 + $0x68] sm:$0xff]  ;;  %v236_v24 = vld [vmem:[#allocation3 + $0x18] sm:$0xff]  ;;  %s1296_s4 = sshll.u32 %s1842_s6, 4  ;;  %s1297_s4 = int_to_ptr.hbm [resolvable:$true] %s1296_s4 }
   0x9   :  { %1306 = vmatmul.msk.f32.vlgmr.msra.gmra.mxu0 %vm60_vm0, %v40_v3  ;;  %204 = vmatpush.msrb.mxu1 %v1532_v2  ;;  %v1555_v6 = vld [vmem:[%s1838_s2] sm:$0xff]  ;;  %v235_v25 = vld [vmem:[#allocation3 + $0x10] sm:$0xff]  ;;  %v234_v26 = vld [vmem:[#allocation3 + $0x8] sm:$0xff] }
   0xa   :  { %255 = vmatpush.msrb.mxu2 %v1532_v2  ;;  %v1567_v10 = vld [vmem:[%s1839_s3] ss:$0 sm:$0xff]  ;;  %v54_v28 = vld [vmem:[%s1836_s0 + $0x70] sm:$0xff]  ;;  %v41_v31 = vld [vmem:[%s1836_s0 + $0x8] sm:$0xff] }
   0xb   :  { %205 = vmatpush.msrb.mxu1 %v1541_v4  ;;  %1319 = vmatmul.msk.f32.vlgmr.msra.gmra.mxu2 %vm60_vm0, %v53_v23  ;;  %v233_v27 = vld [vmem:[#allocation3] sm:$0xff]  ;;  %v288_v48 = vld [vmem:[#allocation3 + $0x38] sm:$0xff]  ;;  %v287_v49 = vld [vmem:[#allocation3 + $0x30] sm:$0xff] }
   0xc   :  { %256 = vmatpush.msrb.mxu2 %v1541_v4  ;;  %306 = vmatpush.msra.mxu3 %v288_v48  ;;  %v286_v50 = vld [vmem:[#allocation3 + $0x28] sm:$0xff]  ;;  %v285_v51 = vld [vmem:[#allocation3 + $0x20] sm:$0xff]  ;;  %v42_v54 = vld [vmem:[%s1836_s0 + $0x10] sm:$0xff] }
   0xd   :  { %206 = vmatpush.msrb.mxu1 %v1548_v5 }
   0xe   :  { %257 = vmatpush.msrb.mxu2 %v1548_v5  ;;  %307 = vmatpush.msra.mxu3 %v287_v49 }
   0xf   :  { %207 = vmatpush.msrb.mxu1 %v1555_v6 }
  0x10   :  { %208 = vmatmul.f32.vlgmr.msrb.gmra.mxu1 %v1481_v7  ;;  %258 = vmatpush.msrb.mxu2 %v1555_v6 }
  0x11   :  { %326 = vmatpush.msra.mxu1 %v236_v24  ;;  %1307 = vmatmul.msk.f32.gmra.mxu0 %vm60_vm0, %v41_v31 }
  0x12   :  { %347 = vmatpush.msra.mxu2 %v1532_v2  ;;  %308 = vmatpush.msra.mxu3 %v286_v50 }
  0x13   :  { %327 = vmatpush.msra.mxu1 %v235_v25  ;;  %1320 = vmatmul.msk.f32.gmra.mxu2 %vm60_vm0, %v54_v28 }
  0x14   :  { %348 = vmatpush.msra.mxu2 %v1541_v4  ;;  %309 = vmatpush.msra.mxu3 %v285_v51 }
  0x15   :  { %328 = vmatpush.msra.mxu1 %v234_v26 }
  0x16   :  { %349 = vmatpush.msra.mxu2 %v1548_v5 }
  0x17   :  { %329 = vmatpush.msra.mxu1 %v233_v27 }
  0x18   :  { %350 = vmatpush.msra.mxu2 %v1555_v6 }
  0x19   :  { %420 = vmatpush.msrb.mxu1 %v1532_v2  ;;  %1308 = vmatmul.msk.f32.gmra.mxu0 %vm60_vm0, %v42_v54 }
  0x1b   :  { %421 = vmatpush.msrb.mxu1 %v1541_v4 }
  0x1d   :  { %422 = vmatpush.msrb.mxu1 %v1548_v5 }
  0x1f   :  { %423 = vmatpush.msrb.mxu1 %v1555_v6 }
  0x85   :  { %v1562_v8 = vpop.f32.mrf.mxu1 }
  0x86   :  { %v123_v9 = vpop.f32.mrf.mxu0 }
  0x87   :  { %v124_v11 = vadd.f32 %v1567_v10, %v123_v9 }
  0x8d   :  { %v209_v12 = vpop.f32.mrf.mxu1 }
  0x8e   :  { %v212_v13 = vadd.f32 %v209_v12, %v124_v11  ;;  %v1596_v33 = vpop.f32.mrf.mxu2  ;;  %v126_v35 = vpop.f32.mrf.mxu0  ;;  %v380_v11 = vld [vmem:[#allocation3 + $0x58] sm:$0xff]  ;;  %v379_v12 = vld [vmem:[#allocation3 + $0x50] sm:$0xff] }
  0x8f   :  { %v127_v36 = vadd.f32 %v1567_v10, %v126_v35  ;;  %398 = vmatpush.msrb.mxu3 %v380_v11  ;;  %v453_v35 = vld [vmem:[#allocation3 + $0x78] sm:$0xff] }
  0x90   :  { %1361 = vtanh.f32 %v212_v13  ;;  %v43_v13 = vld [vmem:[%s1836_s0 + $0x18] sm:$0xff] }
  0x91   :  { %1309 = vmatmul.msk.f32.gmra.mxu0 %vm60_vm0, %v43_v13  ;;  %399 = vmatpush.msrb.mxu3 %v379_v12 }
  0x96   :  { %v1362_v14 = vpop.eup %1361  ;;  %v1598_v34 = vpop.f32.mrf.mxu2 }
  0x97   :  { %218 = vrot.lane.b32.xlu0 %v1362_v14, %s1482_s18  ;;  %v214_v15 = vmul.f32 0.5, %v1362_v14  ;;  %v129_v56 = vpop.f32.mrf.mxu0  ;;  %v378_v14 = vld [vmem:[#allocation3 + $0x48] sm:$0xff] }
  0x98   :  { %v130_v57 = vadd.f32 %v1567_v10, %v129_v56  ;;  %400 = vmatpush.msrb.mxu3 %v378_v14 }
  0x99   :  { %v215_v16 = vadd.f32 0.5, %v214_v15  ;;  %v377_v15 = vld [vmem:[#allocation3 + $0x40] sm:$0xff] }
  0x9a   :  { %401 = vmatpush.msrb.mxu3 %v377_v15 }
  0x9b   :  { %v216_v19 = vmul.f32 0.0, %v215_v16 }
 0x109   :  { %v219_v17 = vpop.permute.xlu0 %218 }
 0x10a   :  { %v221_v18 = vmul.f32 %v219_v17, %v215_v16 }
 0x10c   :  { %223 = vrot.lane.b32.xlu0 %v221_v18, %s1483_s19 }
 0x17e   :  { %v224_v20 = vpop.permute.xlu0 %223 }
 0x17f   :  { %v226_v21 = vadd.f32 %v224_v20, %v216_v19  ;;  %v132_v20 = vpop.f32.mrf.mxu0 }
 0x181   :  { %1363 = vtanh.f32 %v226_v21 }
 0x187   :  { %v1364_v22 = vpop.eup %1363 }
 0x188   :  { %229 = vrot.lane.b32.xlu1 %v1364_v22, %s1482_s18 }
 0x1fa   :  { %v230_v29 = vpop.permute.xlu1 %229 }
 0x1fb   :  { %v232_v30 = vmul.f32 %v230_v29, %v215_v16 }
 0x1fd   :  { %239 = vrot.lane.b32.xlu1 %v232_v30, %s1483_s19 }
 0x26f   :  { %v240_v32 = vpop.permute.xlu1 %239 }
 0x270   :  { %1321 = vmatmul.msk.f32.vlgmr.msrb.gmra.mxu2 %vm188_vm1, %v240_v32  ;;  %1323 = vmatmul.msk.f32.vlgmr.msra.gmra.mxu1 %vm188_vm1, %v240_v32 }
 0x271   :  { %471 = vmatpush.msrb.mxu2 %v453_v35 }
 0x2ed   :  { %v1626_v19 = vpop.f32.mrf.mxu1 }
 0x2f3   :  { %v260_v37 = vpop.f32.mrf.mxu2 }
 0x2f4   :  { %v263_v38 = vadd.f32 %v260_v37, %v127_v36  ;;  %v452_v36 = vld [vmem:[#allocation3 + $0x70] sm:$0xff]  ;;  %v451_v37 = vld [vmem:[#allocation3 + $0x68] sm:$0xff] }
 0x2f5   :  { %472 = vmatpush.msrb.mxu2 %v452_v36 }
 0x2f6   :  { %1365 = vtanh.f32 %v263_v38  ;;  %v450_v38 = vld [vmem:[#allocation3 + $0x60] sm:$0xff] }
 0x2f7   :  { %473 = vmatpush.msrb.mxu2 %v451_v37 }
 0x2f9   :  { %474 = vmatpush.msrb.mxu2 %v450_v38 }
 0x2fc   :  { %v1366_v39 = vpop.eup %1365 }
 0x2fd   :  { %269 = vrot.lane.b32.xlu2 %v1366_v39, %s1482_s18  ;;  %v265_v40 = vmul.f32 0.5, %v1366_v39 }
 0x2ff   :  { %v266_v41 = vadd.f32 0.5, %v265_v40 }
 0x301   :  { %v267_v44 = vmul.f32 %v266_v41, %v226_v21  ;;  %v133_v21 = vadd.f32 %v1567_v10, %v132_v20 }
 0x357   :  { %v270_v42 = vpop.permute.xlu2 %269 }
 0x358   :  { %v272_v43 = vmul.f32 %v270_v42, %v266_v41 }
 0x35a   :  { %274 = vrot.lane.b32.xlu2 %v272_v43, %s1483_s19 }
 0x3b4   :  { %v275_v45 = vpop.permute.xlu2 %274 }
 0x3b5   :  { %v277_v46 = vadd.f32 %v275_v45, %v267_v44 }
 0x3b7   :  { %1367 = vtanh.f32 %v277_v46 }
 0x3bd   :  { %v1368_v47 = vpop.eup %1367 }
 0x3be   :  { %280 = vrot.lane.b32.xlu0 %v1368_v47, %s1482_s18 }
 0x430   :  { %v281_v52 = vpop.permute.xlu0 %280 }
 0x431   :  { %v283_v53 = vmul.f32 %v281_v52, %v266_v41  ;;  %v44_v41 = vld [vmem:[%s1836_s0 + $0x20] sm:$0xff] }
 0x432   :  { %1310 = vmatmul.msk.f32.gmra.mxu0 %vm60_vm0, %v44_v41 }
 0x433   :  { %290 = vrot.lane.b32.xlu1 %v283_v53, %s1483_s19 }
 0x4a5   :  { %v291_v55 = vpop.permute.xlu1 %290 }
 0x4a6   :  { %1322 = vmatmul.msk.f32.vlgmr.msra.gmra.mxu3 %vm188_vm1, %v291_v55  ;;  %1324 = vmatmul.msk.f32.vlgmr.msra.gmra.mxu2 %vm188_vm1, %v291_v55 }
 0x4a7   :  { %493 = vmatpush.msra.mxu3 %v1532_v2  ;;  %566 = vmatpush.msra.mxu2 %v1532_v2 }
 0x4a9   :  { %494 = vmatpush.msra.mxu3 %v1541_v4  ;;  %567 = vmatpush.msra.mxu2 %v1541_v4 }
 0x4ab   :  { %495 = vmatpush.msra.mxu3 %v1548_v5  ;;  %568 = vmatpush.msra.mxu2 %v1548_v5 }
 0x4ad   :  { %496 = vmatpush.msra.mxu3 %v1555_v6  ;;  %569 = vmatpush.msra.mxu2 %v1555_v6 }
 0x4af   :  { %v135_v45 = vpop.f32.mrf.mxu0 }
 0x529   :  { %v352_v58 = vpop.f32.mrf.mxu2  ;;  %v1643_v43 = vpop.f32.mrf.mxu3 }
 0x52a   :  { %v355_v59 = vadd.f32 %v352_v58, %v130_v57  ;;  %v526_v58 = vld [vmem:[#allocation3 + $0x98] sm:$0xff] }
 0x52b   :  { %544 = vmatpush.msra.mxu1 %v526_v58 }
 0x52c   :  { %1369 = vtanh.f32 %v355_v59  ;;  %v525_v59 = vld [vmem:[#allocation3 + $0x90] sm:$0xff] }
 0x52d   :  { %545 = vmatpush.msra.mxu1 %v525_v59 }
 0x532   :  { %v1370_v60 = vpop.eup %1369 }
 0x533   :  { %361 = vrot.lane.b32.xlu2 %v1370_v60, %s1482_s18  ;;  %v357_v61 = vmul.f32 0.5, %v1370_v60  ;;  %v524_v60 = vld [vmem:[#allocation3 + $0x88] sm:$0xff] }
 0x534   :  { %546 = vmatpush.msra.mxu1 %v524_v60 }
 0x535   :  { %v358_v62 = vadd.f32 0.5, %v357_v61  ;;  %v523_v61 = vld [vmem:[#allocation3 + $0x80] sm:$0xff] }
 0x536   :  { %547 = vmatpush.msra.mxu1 %v523_v61 }
 0x537   :  { %v359_v1 = vmul.f32 %v358_v62, %v277_v46  ;;  %v136_v46 = vadd.f32 %v1567_v10, %v135_v45 }
 0x58d   :  { %v362_v63 = vpop.permute.xlu2 %361 }
 0x58e   :  { %v364_v0 = vmul.f32 %v362_v63, %v358_v62 }
 0x590   :  { %366 = vrot.lane.b32.xlu0 %v364_v0, %s1483_s19  ;;  %v45_v0 = vld [vmem:[%s1836_s0 + $0x28] sm:$0xff] }
 0x591   :  { %1311 = vmatmul.msk.f32.gmra.mxu0 %vm60_vm0, %v45_v0 }
 0x602   :  { %v367_v3 = vpop.permute.xlu0 %366 }
 0x603   :  { %v369_v7 = vadd.f32 %v367_v3, %v359_v1 }
 0x605   :  { %1371 = vtanh.f32 %v369_v7 }
 0x60b   :  { %v1372_v9 = vpop.eup %1371 }
 0x60c   :  { %372 = vrot.lane.b32.xlu1 %v1372_v9, %s1482_s18 }
 0x67e   :  { %v373_v16 = vpop.permute.xlu1 %372 }
 0x67f   :  { %v375_v17 = vmul.f32 %v373_v16, %v358_v62 }
 0x681   :  { %382 = vrot.lane.b32.xlu2 %v375_v17, %s1483_s19 }
 0x6db   :  { %v383_v18 = vpop.permute.xlu2 %382 }
 0x6dc   :  { %1325 = vmatmul.msk.f32.vlgmr.msrb.gmra.mxu3 %vm188_vm1, %v383_v18  ;;  %1326 = vmatmul.msk.f32.vlgmr.msrb.gmra.mxu1 %vm188_vm1, %v383_v18 }
 0x6dd   :  { %639 = vmatpush.msrb.mxu1 %v1532_v2 }
 0x6df   :  { %640 = vmatpush.msrb.mxu1 %v1541_v4 }
 0x6e1   :  { %641 = vmatpush.msrb.mxu1 %v1548_v5 }
 0x6e3   :  { %642 = vmatpush.msrb.mxu1 %v1555_v6 }
 0x759   :  { %v425_v22 = vpop.f32.mrf.mxu1 }
 0x75a   :  { %v428_v23 = vadd.f32 %v425_v22, %v133_v21 }
 0x75c   :  { %1373 = vtanh.f32 %v428_v23  ;;  %v599_v23 = vld [vmem:[#allocation3 + $0xb8] sm:$0xff] }
 0x75d   :  { %617 = vmatpush.msrb.mxu3 %v599_v23 }
 0x75f   :  { %v1645_v44 = vpop.f32.mrf.mxu3 }
 0x762   :  { %v1374_v24 = vpop.eup %1373 }
 0x763   :  { %434 = vrot.lane.b32.xlu0 %v1374_v24, %s1482_s18  ;;  %v430_v25 = vmul.f32 0.5, %v1374_v24  ;;  %v598_v24 = vld [vmem:[#allocation3 + $0xb0] sm:$0xff] }
 0x764   :  { %618 = vmatpush.msrb.mxu3 %v598_v24 }
 0x765   :  { %v431_v26 = vadd.f32 0.5, %v430_v25  ;;  %v46_v25 = vld [vmem:[%s1836_s0 + $0x30] sm:$0xff] }
 0x766   :  { %1312 = vmatmul.msk.f32.gmra.mxu0 %vm60_vm0, %v46_v25 }
 0x767   :  { %v432_v29 = vmul.f32 %v431_v26, %v369_v7  ;;  %v138_v7 = vpop.f32.mrf.mxu0 }
 0x768   :  { %v139_v9 = vadd.f32 %v1567_v10, %v138_v7 }
 0x7d5   :  { %v435_v27 = vpop.permute.xlu0 %434 }
 0x7d6   :  { %v437_v28 = vmul.f32 %v435_v27, %v431_v26  ;;  %v596_v27 = vld [vmem:[#allocation3 + $0xa0] sm:$0xff] }
 0x7d8   :  { %439 = vrot.lane.b32.xlu1 %v437_v28, %s1483_s19 }
 0x84a   :  { %v440_v30 = vpop.permute.xlu1 %439 }
 0x84b   :  { %v442_v31 = vadd.f32 %v440_v30, %v432_v29 }
 0x84d   :  { %1375 = vtanh.f32 %v442_v31 }
 0x853   :  { %v1376_v32 = vpop.eup %1375 }
 0x854   :  { %445 = vrot.lane.b32.xlu2 %v1376_v32, %s1482_s18  ;;  %v141_v32 = vpop.f32.mrf.mxu0 }
 0x855   :  { %v142_v35 = vadd.f32 %v1567_v10, %v141_v32 }
 0x8ae   :  { %v446_v39 = vpop.permute.xlu2 %445 }
 0x8af   :  { %v448_v40 = vmul.f32 %v446_v39, %v431_v26  ;;  %v597_v26 = vld [vmem:[#allocation3 + $0xa8] sm:$0xff] }
 0x8b0   :  { %619 = vmatpush.msrb.mxu3 %v597_v26 }
 0x8b1   :  { %455 = vrot.lane.b32.xlu0 %v448_v40, %s1483_s19 }
 0x8b2   :  { %620 = vmatpush.msrb.mxu3 %v596_v27 }
 0x923   :  { %v456_v42 = vpop.permute.xlu0 %455 }
 0x924   :  { %1327 = vmatmul.msk.f32.vlgmr.msrb.gmra.mxu2 %vm188_vm1, %v456_v42  ;;  %1328 = vmatmul.msk.f32.vlgmr.msra.gmra.mxu3 %vm188_vm1, %v456_v42 }
 0x925   :  { %712 = vmatpush.msra.mxu3 %v1532_v2 }
 0x927   :  { %713 = vmatpush.msra.mxu3 %v1541_v4 }
 0x929   :  { %714 = vmatpush.msra.mxu3 %v1548_v5 }
 0x92b   :  { %715 = vmatpush.msra.mxu3 %v1555_v6 }
 0x9a7   :  { %v498_v47 = vpop.f32.mrf.mxu3  ;;  %v1662_v3 = vpop.f32.mrf.mxu2 }
 0x9a8   :  { %v501_v48 = vadd.f32 %v498_v47, %v136_v46 }
 0x9aa   :  { %1377 = vtanh.f32 %v501_v48 }
 0x9b0   :  { %v1378_v49 = vpop.eup %1377 }
 0x9b1   :  { %507 = vrot.lane.b32.xlu1 %v1378_v49, %s1482_s18  ;;  %v503_v50 = vmul.f32 0.5, %v1378_v49  ;;  %v672_v49 = vld [vmem:[#allocation3 + $0xd8] sm:$0xff] }
 0x9b2   :  { %690 = vmatpush.msrb.mxu2 %v672_v49 }
 0x9b3   :  { %v504_v51 = vadd.f32 0.5, %v503_v50  ;;  %v671_v50 = vld [vmem:[#allocation3 + $0xd0] sm:$0xff] }
 0x9b4   :  { %691 = vmatpush.msrb.mxu2 %v671_v50 }
 0x9b5   :  { %v505_v54 = vmul.f32 %v504_v51, %v442_v31 }
 0xa23   :  { %v508_v52 = vpop.permute.xlu1 %507 }
 0xa24   :  { %v510_v53 = vmul.f32 %v508_v52, %v504_v51  ;;  %v669_v52 = vld [vmem:[#allocation3 + $0xc0] sm:$0xff] }
 0xa26   :  { %512 = vrot.lane.b32.xlu2 %v510_v53, %s1483_s19 }
 0xa80   :  { %v513_v55 = vpop.permute.xlu2 %512 }
 0xa81   :  { %v515_v56 = vadd.f32 %v513_v55, %v505_v54  ;;  %v47_v55 = vld [vmem:[%s1836_s0 + $0x38] sm:$0xff] }
 0xa82   :  { %1313 = vmatmul.msk.f32.gmra.mxu0 %vm60_vm0, %v47_v55 }
 0xa83   :  { %1379 = vtanh.f32 %v515_v56 }
 0xa89   :  { %v1380_v57 = vpop.eup %1379 }
 0xa8a   :  { %518 = vrot.lane.b32.xlu0 %v1380_v57, %s1482_s18 }
 0xafc   :  { %v519_v62 = vpop.permute.xlu0 %518 }
 0xafd   :  { %v521_v63 = vmul.f32 %v519_v62, %v504_v51  ;;  %v670_v51 = vld [vmem:[#allocation3 + $0xc8] sm:$0xff] }
 0xafe   :  { %692 = vmatpush.msrb.mxu2 %v670_v51 }
 0xaff   :  { %528 = vrot.lane.b32.xlu1 %v521_v63, %s1483_s19  ;;  %v144_v58 = vpop.f32.mrf.mxu0 }
 0xb00   :  { %693 = vmatpush.msrb.mxu2 %v669_v52  ;;  %v145_v59 = vadd.f32 %v1567_v10, %v144_v58 }
 0xb71   :  { %v529_v1 = vpop.permute.xlu1 %528 }
 0xb72   :  { %1329 = vmatmul.msk.f32.vlgmr.msra.gmra.mxu1 %vm188_vm1, %v529_v1  ;;  %1330 = vmatmul.msk.f32.vlgmr.msra.gmra.mxu2 %vm188_vm1, %v529_v1 }
 0xb73   :  { %785 = vmatpush.msra.mxu2 %v1532_v2 }
 0xb75   :  { %786 = vmatpush.msra.mxu2 %v1541_v4 }
 0xb77   :  { %787 = vmatpush.msra.mxu2 %v1548_v5 }
 0xb79   :  { %788 = vmatpush.msra.mxu2 %v1555_v6 }
 0xbef   :  { %v1679_v31 = vpop.f32.mrf.mxu1 }
 0xbf5   :  { %v571_v11 = vpop.f32.mrf.mxu2 }
 0xbf6   :  { %v574_v12 = vadd.f32 %v571_v11, %v139_v9 }
 0xbf8   :  { %1381 = vtanh.f32 %v574_v12 }
 0xbfe   :  { %v1382_v13 = vpop.eup %1381 }
 0xbff   :  { %580 = vrot.lane.b32.xlu2 %v1382_v13, %s1482_s18  ;;  %v576_v14 = vmul.f32 0.5, %v1382_v13 }
 0xc01   :  { %v577_v15 = vadd.f32 0.5, %v576_v14  ;;  %v745_v14 = vld [vmem:[#allocation3 + $0xf8] sm:$0xff] }
 0xc02   :  { %763 = vmatpush.msra.mxu1 %v745_v14  ;;  %v50_v14 = vld [vmem:[%s1836_s0 + $0x50] sm:$0xff] }
 0xc03   :  { %v578_v18 = vmul.f32 %v577_v15, %v515_v56 }
 0xc59   :  { %v581_v16 = vpop.permute.xlu2 %580 }
 0xc5a   :  { %v583_v17 = vmul.f32 %v581_v16, %v577_v15  ;;  %v743_v16 = vld [vmem:[#allocation3 + $0xe8] sm:$0xff] }
 0xc5c   :  { %585 = vrot.lane.b32.xlu0 %v583_v17, %s1483_s19  ;;  %v742_v17 = vld [vmem:[#allocation3 + $0xe0] sm:$0xff] }
 0xcce   :  { %v586_v20 = vpop.permute.xlu0 %585 }
 0xccf   :  { %v588_v21 = vadd.f32 %v586_v20, %v578_v18 }
 0xcd1   :  { %1383 = vtanh.f32 %v588_v21 }
 0xcd7   :  { %v1384_v22 = vpop.eup %1383 }
 0xcd8   :  { %591 = vrot.lane.b32.xlu1 %v1384_v22, %s1482_s18 }
 0xd4a   :  { %v592_v28 = vpop.permute.xlu1 %591 }
 0xd4b   :  { %v594_v29 = vmul.f32 %v592_v28, %v577_v15  ;;  %v744_v15 = vld [vmem:[#allocation3 + $0xf0] sm:$0xff] }
 0xd4c   :  { %764 = vmatpush.msra.mxu1 %v744_v15 }
 0xd4d   :  { %601 = vrot.lane.b32.xlu2 %v594_v29, %s1483_s19 }
 0xd4e   :  { %765 = vmatpush.msra.mxu1 %v743_v16 }
 0xd50   :  { %766 = vmatpush.msra.mxu1 %v742_v17 }
 0xda7   :  { %v602_v30 = vpop.permute.xlu2 %601 }
 0xda8   :  { %1331 = vmatmul.msk.f32.vlgmr.msrb.gmra.mxu3 %vm188_vm1, %v602_v30  ;;  %1332 = vmatmul.msk.f32.vlgmr.msrb.gmra.mxu1 %vm188_vm1, %v602_v30 }
 0xda9   :  { %858 = vmatpush.msrb.mxu1 %v1532_v2 }
 0xdab   :  { %859 = vmatpush.msrb.mxu1 %v1541_v4 }
 0xdad   :  { %860 = vmatpush.msrb.mxu1 %v1548_v5 }
 0xdaf   :  { %861 = vmatpush.msrb.mxu1 %v1555_v6 }
 0xe25   :  { %v644_v36 = vpop.f32.mrf.mxu1 }
 0xe26   :  { %v647_v37 = vadd.f32 %v644_v36, %v142_v35 }
 0xe28   :  { %1385 = vtanh.f32 %v647_v37 }
 0xe2b   :  { %v1696_v57 = vpop.f32.mrf.mxu3 }
 0xe2e   :  { %v1386_v38 = vpop.eup %1385 }
 0xe2f   :  { %653 = vrot.lane.b32.xlu0 %v1386_v38, %s1482_s18  ;;  %v649_v39 = vmul.f32 0.5, %v1386_v38 }
 0xe31   :  { %v650_v40 = vadd.f32 0.5, %v649_v39 }
 0xe33   :  { %v651_v45 = vmul.f32 %v650_v40, %v588_v21  ;;  %v48_v21 = vld [vmem:[%s1836_s0 + $0x40] sm:$0xff] }
 0xe34   :  { %1314 = vmatmul.msk.f32.gmra.mxu0 %vm60_vm0, %v48_v21 }
 0xea1   :  { %v654_v41 = vpop.permute.xlu0 %653 }
 0xea2   :  { %v656_v42 = vmul.f32 %v654_v41, %v650_v40  ;;  %v817_v41 = vld [vmem:[#allocation3 + $0x110] sm:$0xff] }
 0xea4   :  { %658 = vrot.lane.b32.xlu1 %v656_v42, %s1483_s19  ;;  %v49_v42 = vld [vmem:[%s1836_s0 + $0x48] sm:$0xff] }
 0xea5   :  { %1315 = vmatmul.msk.f32.gmra.mxu0 %vm60_vm0, %v49_v42 }
 0xead   :  { %1316 = vmatmul.msk.f32.gmra.mxu0 %vm60_vm0, %v50_v14 }
 0xeb1   :  { %v147_v24 = vpop.f32.mrf.mxu0 }
 0xeb2   :  { %v148_v25 = vadd.f32 %v1567_v10, %v147_v24 }
 0xf16   :  { %v659_v46 = vpop.permute.xlu1 %658 }
 0xf17   :  { %v661_v47 = vadd.f32 %v659_v46, %v651_v45  ;;  %v816_v45 = vld [vmem:[#allocation3 + $0x108] sm:$0xff]  ;;  %v815_v46 = vld [vmem:[#allocation3 + $0x100] sm:$0xff] }
 0xf19   :  { %1387 = vtanh.f32 %v661_v47 }
 0xf1f   :  { %v1388_v48 = vpop.eup %1387 }
 0xf20   :  { %664 = vrot.lane.b32.xlu2 %v1388_v48, %s1482_s18 }
 0xf22   :  { %v150_v51 = vpop.f32.mrf.mxu0 }
 0xf23   :  { %v151_v52 = vadd.f32 %v1567_v10, %v150_v51 }
 0xf2a   :  { %v153_v17 = vpop.f32.mrf.mxu0 }
 0xf7a   :  { %v665_v53 = vpop.permute.xlu2 %664 }
 0xf7b   :  { %v667_v54 = vmul.f32 %v665_v53, %v650_v40  ;;  %v818_v40 = vld [vmem:[#allocation3 + $0x118] sm:$0xff] }
 0xf7c   :  { %836 = vmatpush.msrb.mxu3 %v818_v40 }
 0xf7d   :  { %674 = vrot.lane.b32.xlu0 %v667_v54, %s1483_s19 }
 0xf7e   :  { %837 = vmatpush.msrb.mxu3 %v817_v41  ;;  %v51_v41 = vld [vmem:[%s1836_s0 + $0x58] sm:$0xff] }
 0xf7f   :  { %1317 = vmatmul.msk.f32.gmra.mxu0 %vm60_vm0, %v51_v41 }
 0xf80   :  { %838 = vmatpush.msrb.mxu3 %v816_v45 }
 0xf82   :  { %839 = vmatpush.msrb.mxu3 %v815_v46 }
 0xfef   :  { %v675_v56 = vpop.permute.xlu0 %674 }
 0xff0   :  { %1333 = vmatmul.msk.f32.vlgmr.msrb.gmra.mxu2 %vm188_vm1, %v675_v56  ;;  %1334 = vmatmul.msk.f32.vlgmr.msra.gmra.mxu3 %vm188_vm1, %v675_v56 }
 0xff1   :  { %931 = vmatpush.msra.mxu3 %v1532_v2 }
 0xff3   :  { %932 = vmatpush.msra.mxu3 %v1541_v4 }
 0xff5   :  { %933 = vmatpush.msra.mxu3 %v1548_v5 }
 0xff7   :  { %934 = vmatpush.msra.mxu3 %v1555_v6 }
 0xffc   :  { %v156_v46 = vpop.f32.mrf.mxu0 }
0x1073   :  { %v717_v60 = vpop.f32.mrf.mxu3  ;;  %v1713_v23 = vpop.f32.mrf.mxu2 }
0x1074   :  { %v720_v61 = vadd.f32 %v717_v60, %v145_v59 }
0x1076   :  { %1389 = vtanh.f32 %v720_v61 }
0x107c   :  { %v1390_v62 = vpop.eup %1389 }
0x107d   :  { %726 = vrot.lane.b32.xlu1 %v1390_v62, %s1482_s18  ;;  %v722_v63 = vmul.f32 0.5, %v1390_v62 }
0x107f   :  { %v723_v0 = vadd.f32 0.5, %v722_v63 }
0x1081   :  { %v724_v9 = vmul.f32 %v723_v0, %v661_v47 }
0x10ef   :  { %v727_v1 = vpop.permute.xlu1 %726 }
0x10f0   :  { %v729_v7 = vmul.f32 %v727_v1, %v723_v0  ;;  %v891_v1 = vld [vmem:[#allocation3 + $0x138] sm:$0xff] }
0x10f1   :  { %909 = vmatpush.msrb.mxu2 %v891_v1 }
0x10f2   :  { %731 = vrot.lane.b32.xlu2 %v729_v7, %s1483_s19  ;;  %v890_v7 = vld [vmem:[#allocation3 + $0x130] sm:$0xff] }
0x10f3   :  { %910 = vmatpush.msrb.mxu2 %v890_v7 }
0x114c   :  { %v732_v11 = vpop.permute.xlu2 %731 }
0x114d   :  { %v734_v12 = vadd.f32 %v732_v11, %v724_v9  ;;  %v889_v9 = vld [vmem:[#allocation3 + $0x128] sm:$0xff]  ;;  %v888_v11 = vld [vmem:[#allocation3 + $0x120] sm:$0xff] }
0x114e   :  { %911 = vmatpush.msrb.mxu2 %v889_v9 }
0x114f   :  { %1391 = vtanh.f32 %v734_v12 }
0x1150   :  { %912 = vmatpush.msrb.mxu2 %v888_v11 }
0x1155   :  { %v1392_v13 = vpop.eup %1391 }
0x1156   :  { %737 = vrot.lane.b32.xlu0 %v1392_v13, %s1482_s18 }
0x11c8   :  { %v738_v18 = vpop.permute.xlu0 %737 }
0x11c9   :  { %v740_v20 = vmul.f32 %v738_v18, %v723_v0  ;;  %v154_v18 = vadd.f32 %v1567_v10, %v153_v17 }
0x11cb   :  { %747 = vrot.lane.b32.xlu1 %v740_v20, %s1483_s19 }
0x123d   :  { %v748_v22 = vpop.permute.xlu1 %747 }
0x123e   :  { %1335 = vmatmul.msk.f32.vlgmr.msra.gmra.mxu1 %vm188_vm1, %v748_v22  ;;  %1336 = vmatmul.msk.f32.vlgmr.msra.gmra.mxu2 %vm188_vm1, %v748_v22 }
0x123f   :  { %1004 = vmatpush.msra.mxu2 %v1532_v2 }
0x1241   :  { %1005 = vmatpush.msra.mxu2 %v1541_v4 }
0x1243   :  { %1006 = vmatpush.msra.mxu2 %v1548_v5 }
0x1245   :  { %1007 = vmatpush.msra.mxu2 %v1555_v6 }
0x12bb   :  { %v1730_v50 = vpop.f32.mrf.mxu1 }
0x12c1   :  { %v790_v26 = vpop.f32.mrf.mxu2 }
0x12c2   :  { %v793_v27 = vadd.f32 %v790_v26, %v148_v25 }
0x12c4   :  { %1393 = vtanh.f32 %v793_v27 }
0x12ca   :  { %v1394_v28 = vpop.eup %1393 }
0x12cb   :  { %799 = vrot.lane.b32.xlu2 %v1394_v28, %s1482_s18  ;;  %v795_v29 = vmul.f32 0.5, %v1394_v28 }
0x12cd   :  { %v796_v30 = vadd.f32 0.5, %v795_v29 }
0x12cf   :  { %v797_v36 = vmul.f32 %v796_v30, %v734_v12 }
0x1325   :  { %v800_v32 = vpop.permute.xlu2 %799 }
0x1326   :  { %v802_v35 = vmul.f32 %v800_v32, %v796_v30 }
0x1328   :  { %804 = vrot.lane.b32.xlu0 %v802_v35, %s1483_s19  ;;  %v964_v35 = vld [vmem:[#allocation3 + $0x158] sm:$0xff] }
0x1329   :  { %982 = vmatpush.msra.mxu1 %v964_v35 }
0x139a   :  { %v805_v37 = vpop.permute.xlu0 %804 }
0x139b   :  { %v807_v38 = vadd.f32 %v805_v37, %v797_v36  ;;  %v963_v36 = vld [vmem:[#allocation3 + $0x150] sm:$0xff]  ;;  %v962_v37 = vld [vmem:[#allocation3 + $0x148] sm:$0xff] }
0x139c   :  { %983 = vmatpush.msra.mxu1 %v963_v36 }
0x139d   :  { %1395 = vtanh.f32 %v807_v38 }
0x139e   :  { %984 = vmatpush.msra.mxu1 %v962_v37  ;;  %v163_v37 = vadd.f32 %v1567_v10, %v1596_v33  ;;  %v1182_v33 = vld [vmem:[#allocation3 + $0x1b0] sm:$0xff] }
0x13a3   :  { %v1396_v39 = vpop.eup %1395 }
0x13a4   :  { %810 = vrot.lane.b32.xlu1 %v1396_v39, %s1482_s18 }
0x1416   :  { %v811_v47 = vpop.permute.xlu1 %810 }
0x1417   :  { %v813_v48 = vmul.f32 %v811_v47, %v796_v30  ;;  %v157_v47 = vadd.f32 %v1567_v10, %v156_v46 }
0x1419   :  { %820 = vrot.lane.b32.xlu2 %v813_v48, %s1483_s19 }
0x1473   :  { %v821_v49 = vpop.permute.xlu2 %820 }
0x1474   :  { %1337 = vmatmul.msk.f32.vlgmr.msrb.gmra.mxu3 %vm188_vm1, %v821_v49  ;;  %1338 = vmatmul.msk.f32.vlgmr.msrb.gmra.mxu1 %vm188_vm1, %v821_v49 }
0x14f1   :  { %v863_v53 = vpop.f32.mrf.mxu1 }
0x14f2   :  { %v866_v54 = vadd.f32 %v863_v53, %v151_v52 }
0x14f4   :  { %1397 = vtanh.f32 %v866_v54 }
0x14f7   :  { %v1747_v16 = vpop.f32.mrf.mxu3 }
0x14fa   :  { %v1398_v55 = vpop.eup %1397 }
0x14fb   :  { %872 = vrot.lane.b32.xlu0 %v1398_v55, %s1482_s18  ;;  %v868_v56 = vmul.f32 0.5, %v1398_v55 }
0x14fd   :  { %v869_v58 = vadd.f32 0.5, %v868_v56 }
0x14ff   :  { %v870_v61 = vmul.f32 %v869_v58, %v807_v38  ;;  %v961_v38 = vld [vmem:[#allocation3 + $0x140] sm:$0xff] }
0x1500   :  { %985 = vmatpush.msra.mxu1 %v961_v38 }
0x1502   :  { %1077 = vmatpush.msrb.mxu1 %v1532_v2 }
0x1504   :  { %1078 = vmatpush.msrb.mxu1 %v1541_v4 }
0x1506   :  { %1079 = vmatpush.msrb.mxu1 %v1548_v5 }
0x1508   :  { %1080 = vmatpush.msrb.mxu1 %v1555_v6 }
0x156d   :  { %v873_v59 = vpop.permute.xlu0 %872 }
0x156e   :  { %v875_v60 = vmul.f32 %v873_v59, %v869_v58 }
0x1570   :  { %877 = vrot.lane.b32.xlu1 %v875_v60, %s1483_s19 }
0x15e2   :  { %v878_v62 = vpop.permute.xlu1 %877 }
0x15e3   :  { %v880_v63 = vadd.f32 %v878_v62, %v870_v61  ;;  %v1037_v61 = vld [vmem:[#allocation3 + $0x178] sm:$0xff]  ;;  %v1036_v62 = vld [vmem:[#allocation3 + $0x170] sm:$0xff] }
0x15e4   :  { %1055 = vmatpush.msrb.mxu3 %v1037_v61 }
0x15e5   :  { %1399 = vtanh.f32 %v880_v63 }
0x15e6   :  { %1056 = vmatpush.msrb.mxu3 %v1036_v62 }
0x15eb   :  { %v1400_v0 = vpop.eup %1399 }
0x15ec   :  { %883 = vrot.lane.b32.xlu2 %v1400_v0, %s1482_s18  ;;  %v1034_v0 = vld [vmem:[#allocation3 + $0x160] sm:$0xff] }
0x1646   :  { %v884_v12 = vpop.permute.xlu2 %883 }
0x1647   :  { %v886_v13 = vmul.f32 %v884_v12, %v869_v58 }
0x1649   :  { %893 = vrot.lane.b32.xlu0 %v886_v13, %s1483_s19 }
0x16bb   :  { %v894_v15 = vpop.permute.xlu0 %893 }
0x16bc   :  { %1339 = vmatmul.msk.f32.vlgmr.msrb.gmra.mxu2 %vm188_vm1, %v894_v15  ;;  %1340 = vmatmul.msk.f32.vlgmr.msra.gmra.mxu3 %vm188_vm1, %v894_v15 }
0x173f   :  { %v936_v20 = vpop.f32.mrf.mxu3  ;;  %v1764_v45 = vpop.f32.mrf.mxu2 }
0x1740   :  { %v939_v21 = vadd.f32 %v936_v20, %v154_v18 }
0x1742   :  { %1401 = vtanh.f32 %v939_v21 }
0x1748   :  { %v1402_v22 = vpop.eup %1401 }
0x1749   :  { %945 = vrot.lane.b32.xlu1 %v1402_v22, %s1482_s18  ;;  %v941_v24 = vmul.f32 0.5, %v1402_v22  ;;  %v1109_v22 = vld [vmem:[#allocation3 + $0x190] sm:$0xff] }
0x174b   :  { %v942_v25 = vadd.f32 0.5, %v941_v24  ;;  %v1108_v24 = vld [vmem:[#allocation3 + $0x188] sm:$0xff] }
0x174d   :  { %v943_v28 = vmul.f32 %v942_v25, %v880_v63  ;;  %v1035_v63 = vld [vmem:[#allocation3 + $0x168] sm:$0xff] }
0x174e   :  { %1057 = vmatpush.msrb.mxu3 %v1035_v63 }
0x1750   :  { %1058 = vmatpush.msrb.mxu3 %v1034_v0 }
0x1752   :  { %1150 = vmatpush.msra.mxu3 %v1532_v2  ;;  %v160_v2 = vadd.f32 %v1567_v10, %v1562_v8  ;;  %v1110_v8 = vld [vmem:[#allocation3 + $0x198] sm:$0xff] }
0x1753   :  { %1128 = vmatpush.msrb.mxu2 %v1110_v8  ;;  %v1183_v10 = vld [vmem:[#allocation3 + $0x1b8] sm:$0xff] }
0x1754   :  { %1151 = vmatpush.msra.mxu3 %v1541_v4 }
0x1755   :  { %1129 = vmatpush.msrb.mxu2 %v1109_v22 }
0x1756   :  { %1152 = vmatpush.msra.mxu3 %v1548_v5 }
0x1757   :  { %1130 = vmatpush.msrb.mxu2 %v1108_v24 }
0x1758   :  { %1153 = vmatpush.msra.mxu3 %v1555_v6 }
0x17bb   :  { %v946_v26 = vpop.permute.xlu1 %945 }
0x17bc   :  { %v948_v27 = vmul.f32 %v946_v26, %v942_v25  ;;  %v1421_v26 = vld [vmem:[%s1838_s2 + $0x18] sm:$0xff] }
0x17be   :  { %950 = vrot.lane.b32.xlu2 %v948_v27, %s1483_s19  ;;  %v1422_v27 = vld [vmem:[%s1838_s2 + $0x10] sm:$0xff] }
0x1818   :  { %v951_v29 = vpop.permute.xlu2 %950 }
0x1819   :  { %v953_v30 = vadd.f32 %v951_v29, %v943_v28  ;;  %v1423_v28 = vld [vmem:[%s1838_s2 + $0x8] sm:$0xff]  ;;  %v1424_v29 = vld [vmem:[%s1838_s2] sm:$0xff] }
0x181b   :  { %1403 = vtanh.f32 %v953_v30 }
0x1821   :  { %v1404_v32 = vpop.eup %1403 }
0x1822   :  { %956 = vrot.lane.b32.xlu0 %v1404_v32, %s1482_s18 }
0x1894   :  { %v957_v39 = vpop.permute.xlu0 %956 }
0x1895   :  { %v959_v40 = vmul.f32 %v957_v39, %v942_v25  ;;  %v1107_v25 = vld [vmem:[#allocation3 + $0x180] sm:$0xff] }
0x1896   :  { %1131 = vmatpush.msrb.mxu2 %v1107_v25 }
0x1897   :  { %966 = vrot.lane.b32.xlu1 %v959_v40, %s1483_s19 }
0x1909   :  { %v967_v42 = vpop.permute.xlu1 %966 }
0x190a   :  { %1341 = vmatmul.msk.f32.vlgmr.msra.gmra.mxu1 %vm188_vm1, %v967_v42  ;;  %1342 = vmatmul.msk.f32.vlgmr.msra.gmra.mxu2 %vm188_vm1, %v967_v42 }
0x190b   :  { %1223 = vmatpush.msra.mxu2 %v1421_v26  ;;  %1201 = vmatpush.msra.mxu1 %v1183_v10 }
0x190d   :  { %1224 = vmatpush.msra.mxu2 %v1422_v27  ;;  %1202 = vmatpush.msra.mxu1 %v1182_v33 }
0x190f   :  { %1225 = vmatpush.msra.mxu2 %v1423_v28 }
0x1911   :  { %1226 = vmatpush.msra.mxu2 %v1424_v29 }
0x1987   :  { %v1777_v11 = vpop.f32.mrf.mxu1 }
0x198d   :  { %v1009_v48 = vpop.f32.mrf.mxu2 }
0x198e   :  { %v1012_v49 = vadd.f32 %v1009_v48, %v157_v47 }
0x1990   :  { %1405 = vtanh.f32 %v1012_v49 }
0x1996   :  { %v1406_v51 = vpop.eup %1405 }
0x1997   :  { %1018 = vrot.lane.b32.xlu2 %v1406_v51, %s1482_s18  ;;  %v1014_v52 = vmul.f32 0.5, %v1406_v51 }
0x1999   :  { %v1015_v53 = vadd.f32 0.5, %v1014_v52 }
0x199b   :  { %v1016_v56 = vmul.f32 %v1015_v53, %v953_v30 }
0x19f1   :  { %v1019_v54 = vpop.permute.xlu2 %1018 }
0x19f2   :  { %v1021_v55 = vmul.f32 %v1019_v54, %v1015_v53  ;;  %v1180_v54 = vld [vmem:[#allocation3 + $0x1a0] sm:$0xff] }
0x19f4   :  { %1023 = vrot.lane.b32.xlu0 %v1021_v55, %s1483_s19 }
0x1a66   :  { %v1024_v58 = vpop.permute.xlu0 %1023 }
0x1a67   :  { %v1026_v59 = vadd.f32 %v1024_v58, %v1016_v56 }
0x1a69   :  { %1407 = vtanh.f32 %v1026_v59 }
0x1a6f   :  { %v1408_v60 = vpop.eup %1407 }
0x1a70   :  { %1029 = vrot.lane.b32.xlu1 %v1408_v60, %s1482_s18  ;;  %v1425_v60 = vld [vmem:[%s1839_s3] ss:$0 sm:$0xff] }
0x1a71   :  { %v166_v61 = vadd.f32 %v1425_v60, %v1598_v34  ;;  %v1256_v34 = vld [vmem:[#allocation3 + $0x1d8] sm:$0xff] }
0x1ae2   :  { %v1030_v1 = vpop.permute.xlu1 %1029 }
0x1ae3   :  { %v1032_v7 = vmul.f32 %v1030_v1, %v1015_v53  ;;  %v1181_v53 = vld [vmem:[#allocation3 + $0x1a8] sm:$0xff] }
0x1ae4   :  { %1203 = vmatpush.msra.mxu1 %v1181_v53 }
0x1ae5   :  { %1039 = vrot.lane.b32.xlu2 %v1032_v7, %s1483_s19 }
0x1ae6   :  { %1204 = vmatpush.msra.mxu1 %v1180_v54 }
0x1b3f   :  { %v1040_v9 = vpop.permute.xlu2 %1039 }
0x1b40   :  { %1343 = vmatmul.msk.f32.vlgmr.msrb.gmra.mxu3 %vm188_vm1, %v1040_v9  ;;  %1344 = vmatmul.msk.f32.vlgmr.msrb.gmra.mxu1 %vm188_vm1, %v1040_v9 }
0x1b41   :  { %1274 = vmatpush.msrb.mxu3 %v1256_v34 }
0x1bbd   :  { %v1082_v12 = vpop.f32.mrf.mxu1 }
0x1bbe   :  { %v1085_v4 = vadd.f32 %v1082_v12, %v160_v2 }
0x1bc0   :  { %1409 = vtanh.f32 %v1085_v4 }
0x1bc3   :  { %v1799_v36 = vpop.f32.mrf.mxu3 }
0x1bc6   :  { %v1410_v5 = vpop.eup %1409 }
0x1bc7   :  { %1091 = vrot.lane.b32.xlu0 %v1410_v5, %s1482_s18  ;;  %v1087_v6 = vmul.f32 0.5, %v1410_v5 }
0x1bc9   :  { %v1088_v13 = vadd.f32 0.5, %v1087_v6 }
0x1bcb   :  { %v1089_v17 = vmul.f32 %v1088_v13, %v1026_v59 }
0x1c39   :  { %v1092_v14 = vpop.permute.xlu0 %1091 }
0x1c3a   :  { %v1094_v15 = vmul.f32 %v1092_v14, %v1088_v13  ;;  %v1254_v14 = vld [vmem:[#allocation3 + $0x1c8] sm:$0xff] }
0x1c3c   :  { %1096 = vrot.lane.b32.xlu1 %v1094_v15, %s1483_s19  ;;  %v1253_v15 = vld [vmem:[#allocation3 + $0x1c0] sm:$0xff] }
0x1cae   :  { %v1097_v18 = vpop.permute.xlu1 %1096 }
0x1caf   :  { %v1099_v20 = vadd.f32 %v1097_v18, %v1089_v17 }
0x1cb1   :  { %1411 = vtanh.f32 %v1099_v20 }
0x1cb7   :  { %v1412_v21 = vpop.eup %1411 }
0x1cb8   :  { %1102 = vrot.lane.b32.xlu2 %v1412_v21, %s1482_s18  ;;  %v332_v21 = vadd.f32 %v1626_v19, %v1643_v43 }
0x1cba   :  { %v406_v8 = vadd.f32 %v1645_v44, %v332_v21 }
0x1cbc   :  { %v479_v22 = vadd.f32 %v1662_v3, %v406_v8  ;;  %v1360_v3 = vld [vmem:[%s1841_s5] ss:$0 sm:$0xff] }
0x1cbe   :  { %v552_v24 = vadd.f32 %v1679_v31, %v479_v22 }
0x1cc0   :  { %v625_v25 = vadd.f32 %v1696_v57, %v552_v24 }
0x1cc2   :  { %v698_v26 = vadd.f32 %v1713_v23, %v625_v25 }
0x1cc4   :  { %v771_v27 = vadd.f32 %v1730_v50, %v698_v26 }
0x1cc6   :  { %v844_v28 = vadd.f32 %v1747_v16, %v771_v27 }
0x1cc8   :  { %v917_v29 = vadd.f32 %v1764_v45, %v844_v28 }
0x1d12   :  { %v1103_v30 = vpop.permute.xlu2 %1102 }
0x1d13   :  { %v1105_v32 = vmul.f32 %v1103_v30, %v1088_v13  ;;  %v1255_v13 = vld [vmem:[#allocation3 + $0x1d0] sm:$0xff]  ;;  %v990_v30 = vadd.f32 %v1777_v11, %v917_v29 }
0x1d14   :  { %1275 = vmatpush.msrb.mxu3 %v1255_v13 }
0x1d15   :  { %1112 = vrot.lane.b32.xlu0 %v1105_v32, %s1483_s19  ;;  %v1063_v19 = vadd.f32 %v1799_v36, %v990_v30 }
0x1d16   :  { %1276 = vmatpush.msrb.mxu3 %v1254_v14 }
0x1d18   :  { %1277 = vmatpush.msrb.mxu3 %v1253_v15 }
0x1d87   :  { %v1113_v35 = vpop.permute.xlu0 %1112 }
0x1d88   :  { %1345 = vmatmul.msk.f32.vlgmr.msrb.gmra.mxu2 %vm188_vm1, %v1113_v35  ;;  %1346 = vmatmul.msk.f32.vlgmr.msra.gmra.mxu3 %vm188_vm1, %v1113_v35 }
0x1e0b   :  { %v1155_v38 = vpop.f32.mrf.mxu3  ;;  %v1133_v59 = vpop.f32.mrf.mxu2 }
0x1e0c   :  { %v1158_v39 = vadd.f32 %v1155_v38, %v163_v37  ;;  %v1136_v44 = vadd.f32 %v1133_v59, %v1063_v19 }
0x1e0e   :  { %1413 = vtanh.f32 %v1158_v39 }
0x1e14   :  { %v1414_v40 = vpop.eup %1413 }
0x1e15   :  { %1164 = vrot.lane.b32.xlu1 %v1414_v40, %s1482_s18  ;;  %v1160_v41 = vmul.f32 0.5, %v1414_v40 }
0x1e17   :  { %v1161_v42 = vadd.f32 0.5, %v1160_v41 }
0x1e19   :  { %v1162_v48 = vmul.f32 %v1161_v42, %v1099_v20 }
0x1e87   :  { %v1165_v46 = vpop.permute.xlu1 %1164 }
0x1e88   :  { %v1167_v47 = vmul.f32 %v1165_v46, %v1161_v42 }
0x1e8a   :  { %1169 = vrot.lane.b32.xlu2 %v1167_v47, %s1483_s19 }
0x1ee4   :  { %v1170_v49 = vpop.permute.xlu2 %1169 }
0x1ee5   :  { %v1172_v51 = vadd.f32 %v1170_v49, %v1162_v48 }
0x1ee7   :  { %1415 = vtanh.f32 %v1172_v51 }
0x1eed   :  { %v1416_v52 = vpop.eup %1415 }
0x1eee   :  { %1175 = vrot.lane.b32.xlu0 %v1416_v52, %s1482_s18 }
0x1f60   :  { %v1176_v55 = vpop.permute.xlu0 %1175 }
0x1f61   :  { %v1178_v56 = vmul.f32 %v1176_v55, %v1161_v42 }
0x1f63   :  { %1185 = vrot.lane.b32.xlu1 %v1178_v56, %s1483_s19 }
0x1fd5   :  { %v1186_v58 = vpop.permute.xlu1 %1185 }
0x1fd6   :  { %1347 = vmatmul.msk.f32.vlgmr.msra.gmra.mxu1 %vm188_vm1, %v1186_v58  ;;  %1348 = vmatmul.msk.f32.vlgmr.msra.gmra.mxu2 %vm188_vm1, %v1186_v58 }
0x2053   :  { %v1206_v43 = vpop.f32.mrf.mxu1 }
0x2054   :  { %v1209_v32 = vadd.f32 %v1206_v43, %v1136_v44 }
0x2059   :  { %v1228_v62 = vpop.f32.mrf.mxu2 }
0x205a   :  { %v1231_v63 = vadd.f32 %v1228_v62, %v166_v61 }
0x205c   :  { %1417 = vtanh.f32 %v1231_v63 }
0x2062   :  { %v1418_v0 = vpop.eup %1417 }
0x2063   :  { %1237 = vrot.lane.b32.xlu2 %v1418_v0, %s1482_s18  ;;  %v1233_v1 = vmul.f32 0.5, %v1418_v0 }
0x2065   :  { %v1234_v7 = vadd.f32 0.5, %v1233_v1 }
0x2067   :  { %v1235_v12 = vmul.f32 %v1234_v7, %v1172_v51 }
0x20bd   :  { %v1238_v9 = vpop.permute.xlu2 %1237 }
0x20be   :  { %v1240_v2 = vmul.f32 %v1238_v9, %v1234_v7 }
0x20c0   :  { %1242 = vrot.lane.b32.xlu0 %v1240_v2, %s1483_s19 }
0x2132   :  { %v1243_v4 = vpop.permute.xlu0 %1242 }
0x2133   :  { %v1245_v5 = vadd.f32 %v1243_v4, %v1235_v12 }
0x2135   :  { %1419 = vtanh.f32 %v1245_v5 }
0x213b   :  { %v1420_v6 = vpop.eup %1419 }
0x213c   :  { %1248 = vrot.lane.b32.xlu1 %v1420_v6, %s1482_s18 }
0x21ae   :  { %v1249_v17 = vpop.permute.xlu1 %1248 }
0x21af   :  { %v1251_v18 = vmul.f32 %v1249_v17, %v1234_v7 }
0x21b1   :  { %1258 = vrot.lane.b32.xlu2 %v1251_v18, %s1483_s19  ;;  %s1484_s19 = smov [#allocation6]  }
0x21b2   :  { %s1294_s30 = sshll.u32 %s1484_s19, 4  ;;  %s1295_s30 = int_to_ptr.vmem [resolvable:$true] %s1294_s30 }
0x220b   :  { %v1259_v20 = vpop.permute.xlu2 %1258 }
0x220c   :  { %1349 = vmatmul.msk.f32.vlgmr.msrb.gmra.mxu3 %vm188_vm1, %v1259_v20 }
0x228f   :  { %v1279_v31 = vpop.f32.mrf.mxu3 }
0x2290   :  { %v1282_v57 = vadd.f32 %v1279_v31, %v1209_v32 }
0x2292   :  { %v1287_v23 = vadd.f32 %v1360_v3, %v1282_v57 }
0x2294   :  { %1288 = vst [vmem:[#allocation6] sm:$0xff] %v1287_v23 }
0x2295   :  { %1299 = dma.vmem_to_hbm [thread:$0]  %s1295_s30, 128, %s1297_s4, [#allocation5]  }
0x2296   :  { %1476 = dma.done.wait [#allocation5], 128  }
0x2297   :  { %1477 = vsyncadd [#allocation5], 4294967168 }
0x2298   :  { %1304 = vsyncpa [#allocation4], 1 }
0x2299   :  { %1305 = vsyncpa [#allocation5], 1 }

</bundles_post_ra>
